<compile_context>
chip_gen: v7x
topology: tpu7x:2x2x1
jax: 0.10.0
libtpu: 0.0.40
codegen_flags: <defaults>
</compile_context>

<pallas_src>
import functools

import jax
import jax.numpy as jnp
from jax.experimental import pallas as pl
from jax.experimental.pallas import tpu as pltpu

BN_EPS = 1e-5

IN_F = 100     # Linear1 in_features
H1_F = 256    # Linear1 out_features
H2_F = 512    # Linear2 out_features / BatchNorm1d features
OUT_F = 784   # Linear3 out_features
OUT_PAD = 896  # 784 -> 896 (= 7*128) lane-dense kernel output

FUSED_MAX_B = 1024   # single-tile fully-fused path up to this batch size
DEFAULT_MAX_TB = 1024  # batch-tile cap for the two-stage path


def _round_up(n, m):
    return (n + m - 1) // m * m


def _cdiv(a, b):
    return -(-a // b)


def _wspec(shape):
    """Whole-array block, same block every grid step -> stays VMEM-resident."""
    return pl.BlockSpec(shape, lambda *_: (0,) * len(shape))


# Safe on v5e/v6e/v7x; well above the <= ~20 MiB footprints used here.
_VMEM_LIMIT = 32 * 1024 * 1024


# --------------------------------------------------------------------------
# Fully-fused kernel (whole batch in one tile): Linear1 + LeakyReLU + Linear2
# + BatchNorm (full-batch, training mode) + ReLU + Linear3 + Tanh.
# --------------------------------------------------------------------------
def _fused_kernel(x_ref, w1_ref, b1_ref, w2_ref, b2_ref, gamma_ref, beta_ref,
                  w3_ref, b3_ref, o_ref):
    x = x_ref[...].astype(jnp.bfloat16)                      # [B, 100]
    h = jnp.dot(x, w1_ref[...],
                preferred_element_type=jnp.float32) + b1_ref[...]
    h = jnp.maximum(h, 0.2 * h)                               # LeakyReLU(0.2)

    h2 = jnp.dot(h.astype(jnp.bfloat16), w2_ref[...],
                 preferred_element_type=jnp.float32) + b2_ref[...]   # [B, 512]

    # Full-batch BatchNorm1d stats (biased variance), folded to scale/shift.
    n = h2.shape[0]
    mean = jnp.sum(h2, axis=0, keepdims=True) / n
    var = jnp.maximum(jnp.sum(h2 * h2, axis=0, keepdims=True) / n
                      - mean * mean, 0.0)
    scale = gamma_ref[...] * jax.lax.rsqrt(var + BN_EPS)
    shift = beta_ref[...] - mean * scale

    h3 = jnp.maximum(h2 * scale + shift, 0.0)                 # BN + ReLU
    y = jnp.dot(h3.astype(jnp.bfloat16), w3_ref[...],
                preferred_element_type=jnp.float32) + b3_ref[...]
    o_ref[...] = jnp.tanh(y)                                  # f32 tanh (v5e-safe)


# --------------------------------------------------------------------------
# Two-stage tiled path for large batches.
# Stage 1: Linear1 + LeakyReLU + Linear2; h2 stored bf16; per-tile masked
#          partial BN sums (from the pre-rounding f32 h2).
# --------------------------------------------------------------------------
def _stage1_kernel(x_ref, w1_ref, b1_ref, w2_ref, b2_ref,
                   h2_ref, psum_ref, psumsq_ref, *, tb, b_real):
    i = pl.program_id(0)

    x = x_ref[...].astype(jnp.bfloat16)                       # [TB, 100]
    h = jnp.dot(x, w1_ref[...],
                preferred_element_type=jnp.float32) + b1_ref[...]
    h = jnp.maximum(h, 0.2 * h)                                # LeakyReLU(0.2)

    h2 = jnp.dot(h.astype(jnp.bfloat16), w2_ref[...],
                 preferred_element_type=jnp.float32) + b2_ref[...]
    h2_ref[...] = h2.astype(jnp.bfloat16)                      # bf16 inter-stage

    # Partial BN statistics; padded batch rows (global row >= b_real) masked.
    row = i * tb + jax.lax.broadcasted_iota(jnp.int32, (tb, 1), 0)
    mask = (row < b_real).astype(jnp.float32)
    hm = h2 * mask
    psum_ref[...] = jnp.sum(hm, axis=0, keepdims=True)[None]        # [1,1,512]
    psumsq_ref[...] = jnp.sum(hm * hm, axis=0, keepdims=True)[None]  # [1,1,512]


# Stage 2: BN apply (pre-folded scale/shift) + ReLU + Linear3 (padded) + Tanh.
def _stage2_kernel(h2_ref, scale_ref, shift_ref, w3_ref, b3_ref, o_ref):
    h2 = h2_ref[...].astype(jnp.float32)
    h = jnp.maximum(h2 * scale_ref[...] + shift_ref[...], 0.0)
    y = jnp.dot(h.astype(jnp.bfloat16), w3_ref[...],
                preferred_element_type=jnp.float32) + b3_ref[...]
    o_ref[...] = jnp.tanh(y)


# --------------------------------------------------------------------------
# Parameter handling
# --------------------------------------------------------------------------
def init_params(key):
    """Deterministic init (PyTorch Linear-style uniform bounds).

    Weights stored pre-transposed as [in_features, out_features], f32.
    """
    ks = jax.random.split(key, 6)

    def lin(kw, kb, fan_in, fan_out):
        bound = 1.0 / jnp.sqrt(fan_in)
        w = jax.random.uniform(kw, (fan_in, fan_out), jnp.float32, -bound, bound)
        b = jax.random.uniform(kb, (1, fan_out), jnp.float32, -bound, bound)
        return w, b

    w1, b1 = lin(ks[0], ks[1], IN_F, H1_F)
    w2, b2 = lin(ks[2], ks[3], H1_F, H2_F)
    w3, b3 = lin(ks[4], ks[5], H2_F, OUT_F)
    gamma = jnp.ones((1, H2_F), jnp.float32)   # BatchNorm1d weight init
    beta = jnp.zeros((1, H2_F), jnp.float32)   # BatchNorm1d bias init
    return (w1, b1, w2, b2, gamma, beta, w3, b3)


def prepare_params(params):
    """One-time cast/pad into the kernel-ready layout."""
    (w1, b1, w2, b2, gamma, beta, w3, b3) = params
    w1b = w1.astype(jnp.bfloat16)                                    # [100,256]
    w2b = w2.astype(jnp.bfloat16)                                    # [256,512]
    w3p = (jnp.zeros((H2_F, OUT_PAD), jnp.float32)
           .at[:, :OUT_F].set(w3).astype(jnp.bfloat16))              # [512,896]
    b3p = jnp.zeros((1, OUT_PAD), jnp.float32).at[:, :OUT_F].set(b3)
    return (w1b, b1, w2b, b2, gamma, beta, w3p, b3p)


# --------------------------------------------------------------------------
# Forward
# --------------------------------------------------------------------------
def _fused_forward(x, prepped):
    (w1b, b1, w2b, b2, gamma, beta, w3p, b3p) = prepped
    B = x.shape[0]
    cp = pltpu.CompilerParams(dimension_semantics=("arbitrary",),
                              vmem_limit_bytes=_VMEM_LIMIT)
    return pl.pallas_call(
        _fused_kernel,
        grid=(1,),
        in_specs=[
            pl.BlockSpec((B, IN_F), lambda i: (0, 0)),   # x (unpadded, K=100)
            _wspec((IN_F, H1_F)),                        # w1 (bf16)
            _wspec((1, H1_F)),                           # b1
            _wspec((H1_F, H2_F)),                        # w2 (bf16)
            _wspec((1, H2_F)),                           # b2
            _wspec((1, H2_F)),                           # gamma
            _wspec((1, H2_F)),                           # beta
            _wspec((H2_F, OUT_PAD)),                     # w3 (bf16, padded)
            _wspec((1, OUT_PAD)),                        # b3 (padded)
        ],
        out_specs=pl.BlockSpec((B, OUT_PAD), lambda i: (0, 0)),
        out_shape=jax.ShapeDtypeStruct((B, OUT_PAD), jnp.float32),
        compiler_params=cp,
    )(x, w1b, b1, w2b, b2, gamma, beta, w3p, b3p)


def _two_stage_forward(x, prepped, max_tb):
    (w1b, b1, w2b, b2, gamma, beta, w3p, b3p) = prepped
    B = x.shape[0]

    # Balanced batch tiles, multiple of 16 (bf16 sublane packing for h2).
    nt = max(1, _cdiv(B, max_tb))
    tb = _round_up(_cdiv(B, nt), 16)
    bp = nt * tb
    if bp > B:   # pad only when the tile split requires it (<= 15 rows/tile)
        x = jnp.pad(x, ((0, bp - B), (0, 0)))

    cp = pltpu.CompilerParams(
        dimension_semantics=("parallel",),   # batch axis -> both v7x TCs
        vmem_limit_bytes=_VMEM_LIMIT,
    )

    # ---- Stage 1: Linear1 + LeakyReLU + Linear2, bf16 h2 + partial stats ----
    h2, psum, psumsq = pl.pallas_call(
        functools.partial(_stage1_kernel, tb=tb, b_real=B),
        grid=(nt,),
        in_specs=[
            pl.BlockSpec((tb, IN_F), lambda i: (i, 0)),     # x tile (K=100)
            _wspec((IN_F, H1_F)),                           # w1 (bf16)
            _wspec((1, H1_F)),                              # b1
            _wspec((H1_F, H2_F)),                           # w2 (bf16)
            _wspec((1, H2_F)),                              # b2
        ],
        out_specs=[
            pl.BlockSpec((tb, H2_F), lambda i: (i, 0)),       # h2 tile (bf16)
            pl.BlockSpec((1, 1, H2_F), lambda i: (i, 0, 0)),  # partial sum
            pl.BlockSpec((1, 1, H2_F), lambda i: (i, 0, 0)),  # partial sumsq
        ],
        out_shape=[
            jax.ShapeDtypeStruct((bp, H2_F), jnp.bfloat16),
            jax.ShapeDtypeStruct((nt, 1, H2_F), jnp.float32),
            jax.ShapeDtypeStruct((nt, 1, H2_F), jnp.float32),
        ],
        compiler_params=cp,
    )(x, w1b, b1, w2b, b2)

    # Full-batch BN stats (training mode, biased variance), folded once.
    mean = jnp.sum(psum, axis=0) / B                        # [1, 512]
    var = jnp.maximum(jnp.sum(psumsq, axis=0) / B - mean * mean, 0.0)
    inv_std = jax.lax.rsqrt(var + BN_EPS)
    scale = gamma * inv_std
    shift = beta - mean * scale

    # ---- Stage 2: BN apply + ReLU + Linear3 + Tanh ----
    out = pl.pallas_call(
        _stage2_kernel,
        grid=(nt,),
        in_specs=[
            pl.BlockSpec((tb, H2_F), lambda i: (i, 0)),     # h2 tile (bf16)
            _wspec((1, H2_F)),                              # scale
            _wspec((1, H2_F)),                              # shift
            _wspec((H2_F, OUT_PAD)),                        # w3 (bf16, padded)
            _wspec((1, OUT_PAD)),                           # b3 (padded)
        ],
        out_specs=pl.BlockSpec((tb, OUT_PAD), lambda i: (i, 0)),
        out_shape=jax.ShapeDtypeStruct((bp, OUT_PAD), jnp.float32),
        compiler_params=cp,
    )(h2, scale, shift, w3p, b3p)

    return out


@functools.partial(jax.jit, static_argnames=("force_two_stage", "max_tb"))
def _forward_padded(x, prepped, force_two_stage=False, max_tb=DEFAULT_MAX_TB):
    """Returns the lane-dense padded output [bp, 896]."""
    B = x.shape[0]
    if (not force_two_stage) and B <= FUSED_MAX_B:
        return _fused_forward(x, prepped)
    return _two_stage_forward(x, prepped, max_tb)


def generator_forward(x, prepped, *, force_two_stage=False,
                      max_tb=DEFAULT_MAX_TB):
    """x: [B, 100] float32 -> [B, 784] float32."""
    out = _forward_padded(x, prepped, force_two_stage=force_two_stage,
                          max_tb=max_tb)
    # Consumer-side slice of the lane-dense padded buffer (kept out of the
    # Pallas pipeline per the perf review).
    return out[:x.shape[0], :OUT_F]


# --------------------------------------------------------------------------
# References
# --------------------------------------------------------------------------
def reference_forward(x, params):
    """Pure-f32 JAX reference with the original module semantics."""
    (w1, b1, w2, b2, gamma, beta, w3, b3) = params
    h = x @ w1 + b1
    h = jnp.where(h > 0, h, 0.2 * h)
    h = h @ w2 + b2
    mean = jnp.mean(h, axis=0, keepdims=True)
    var = jnp.mean((h - mean) ** 2, axis=0, keepdims=True)
    h = (h - mean) * jax.lax.rsqrt(var + BN_EPS) * gamma + beta
    h = jnp.maximum(h, 0.0)
    return jnp.tanh(h @ w3 + b3)


def reference_forward_bf16(x, params, *, h2_in_bf16=False):
    """Emulates the kernel's bf16-operand / f32-accumulate matmuls and folded
    BN apply (tight correctness check).  h2_in_bf16 mirrors the two-stage
    path's bf16 inter-stage h2 rounding."""
    (w1, b1, w2, b2, gamma, beta, w3, b3) = params

    def dot(a, b):
        return jnp.dot(a.astype(jnp.bfloat16), b.astype(jnp.bfloat16),
                       preferred_element_type=jnp.float32)

    h = dot(x, w1) + b1
    h = jnp.maximum(h, 0.2 * h)
    h2 = dot(h, w2) + b2
    mean = jnp.mean(h2, axis=0, keepdims=True)
    var = jnp.maximum(jnp.mean(h2 * h2, axis=0, keepdims=True) - mean * mean,
                      0.0)
    inv_std = jax.lax.rsqrt(var + BN_EPS)
    scale = gamma * inv_std
    shift = beta - mean * scale
    if h2_in_bf16:
        h2 = h2.astype(jnp.bfloat16).astype(jnp.float32)
    h = jnp.maximum(h2 * scale + shift, 0.0)
    return jnp.tanh(dot(h, w3) + b3)


if __name__ == "__main__":
    key = jax.random.PRNGKey(0)
    k_param, k_x1, k_x2 = jax.random.split(key, 3)

    params = init_params(k_param)
    prepped = prepare_params(params)

    # ---- Fully-fused single-kernel path (small batch, default) ----
    B1 = 8
    x1 = jax.random.normal(k_x1, (B1, IN_F), dtype=jnp.float32)
    out1 = jax.block_until_ready(generator_forward(x1, prepped))
    assert out1.shape == (B1, OUT_F), out1.shape

    err1 = float(jnp.max(jnp.abs(out1 - reference_forward_bf16(x1, params))))
    assert err1 < 2e-3, f"fused path vs bf16-emulating reference: {err1}"
    err1_f32 = float(jnp.max(jnp.abs(out1 - reference_forward(x1, params))))
    assert err1_f32 < 2e-1, f"fused path vs f32 reference: {err1_f32}"

    # ---- Two-stage tiled path (large-batch code path, exercised here with
    # tiny tiles: B=40, max_tb=16 -> 3 tiles, masked padded rows, bf16 h2) ----
    B2 = 40
    x2 = jax.random.normal(k_x2, (B2, IN_F), dtype=jnp.float32)
    out2 = jax.block_until_ready(
        generator_forward(x2, prepped, force_two_stage=True, max_tb=16))
    assert out2.shape == (B2, OUT_F), out2.shape

    err2 = float(jnp.max(jnp.abs(
        out2 - reference_forward_bf16(x2, params, h2_in_bf16=True))))
    assert err2 < 2e-3, f"two-stage path vs bf16-emulating reference: {err2}"
    err2_f32 = float(jnp.max(jnp.abs(out2 - reference_forward(x2, params))))
    assert err2_f32 < 2e-1, f"two-stage path vs f32 reference: {err2_f32}"

    print("KERNEL_OK")
</pallas_src>

<mosaic_0001>
module attributes {stable_mosaic.version = 11 : i64} {
  func.func @_fused_kernel(%arg0: i32, %arg1: memref<8x100xf32, #tpu.memory_space<vmem>>, %arg2: memref<100x256xbf16, #tpu.memory_space<vmem>>, %arg3: memref<1x256xf32, #tpu.memory_space<vmem>>, %arg4: memref<256x512xbf16, #tpu.memory_space<vmem>>, %arg5: memref<1x512xf32, #tpu.memory_space<vmem>>, %arg6: memref<1x512xf32, #tpu.memory_space<vmem>>, %arg7: memref<1x512xf32, #tpu.memory_space<vmem>>, %arg8: memref<512x896xbf16, #tpu.memory_space<vmem>>, %arg9: memref<1x896xf32, #tpu.memory_space<vmem>>, %arg10: memref<8x896xf32, #tpu.memory_space<vmem>>) attributes {dimension_semantics = [#tpu.dimension_semantics<arbitrary>], iteration_bounds = array<i64: 1>, scalar_prefetch = 0 : i64, scratch_operands = 0 : i64, tpu.core_type = #tpu.core_type<tc>, window_params = [{pipeline_mode = #tpu.pipeline_mode<synchronous>, transform_indices = @transform_0, window_bounds = array<i64: 8, 100>}, {pipeline_mode = #tpu.pipeline_mode<synchronous>, transform_indices = @transform_1, window_bounds = array<i64: 100, 256>}, {pipeline_mode = #tpu.pipeline_mode<synchronous>, transform_indices = @transform_2, window_bounds = array<i64: 1, 256>}, {pipeline_mode = #tpu.pipeline_mode<synchronous>, transform_indices = @transform_3, window_bounds = array<i64: 256, 512>}, {pipeline_mode = #tpu.pipeline_mode<synchronous>, transform_indices = @transform_4, window_bounds = array<i64: 1, 512>}, {pipeline_mode = #tpu.pipeline_mode<synchronous>, transform_indices = @transform_5, window_bounds = array<i64: 1, 512>}, {pipeline_mode = #tpu.pipeline_mode<synchronous>, transform_indices = @transform_6, window_bounds = array<i64: 1, 512>}, {pipeline_mode = #tpu.pipeline_mode<synchronous>, transform_indices = @transform_7, window_bounds = array<i64: 512, 896>}, {pipeline_mode = #tpu.pipeline_mode<synchronous>, transform_indices = @transform_8, window_bounds = array<i64: 1, 896>}, {pipeline_mode = #tpu.pipeline_mode<synchronous>, transform_indices = @transform_9, window_bounds = array<i64: 8, 896>}]} {
    %c0 = arith.constant 0 : index
    %c0_0 = arith.constant 0 : index
    %0 = vector.load %arg1[%c0, %c0_0] : memref<8x100xf32, #tpu.memory_space<vmem>>, vector<8x100xf32>
    %1 = arith.truncf %0 : vector<8x100xf32> to vector<8x100xbf16>
    %c0_1 = arith.constant 0 : index
    %c0_2 = arith.constant 0 : index
    %2 = vector.load %arg2[%c0_1, %c0_2] : memref<100x256xbf16, #tpu.memory_space<vmem>>, vector<100x256xbf16>
    %cst = arith.constant dense<0.000000e+00> : vector<8x256xf32>
    %3 = tpu.matmul %1, %2, %cst {dimension_numbers = #tpu.dot_dimension_numbers<[1], [0], [0], [1], [0, 0, 1, 1], [], []>} : vector<8x100xbf16>, vector<100x256xbf16>, vector<8x256xf32> -> vector<8x256xf32>
    %c0_3 = arith.constant 0 : index
    %c0_4 = arith.constant 0 : index
    %4 = vector.load %arg3[%c0_3, %c0_4] : memref<1x256xf32, #tpu.memory_space<vmem>>, vector<1x256xf32>
    %5 = vector.broadcast %4 : vector<1x256xf32> to vector<8x256xf32>
    %6 = arith.addf %3, %5 : vector<8x256xf32>
    %cst_5 = arith.constant 2.000000e-01 : f32
    %7 = vector.broadcast %cst_5 : f32 to vector<8x256xf32>
    %8 = arith.mulf %7, %6 : vector<8x256xf32>
    %9 = arith.maximumf %6, %8 : vector<8x256xf32>
    %10 = arith.truncf %9 : vector<8x256xf32> to vector<8x256xbf16>
    %c0_6 = arith.constant 0 : index
    %c0_7 = arith.constant 0 : index
    %11 = vector.load %arg4[%c0_6, %c0_7] : memref<256x512xbf16, #tpu.memory_space<vmem>>, vector<256x512xbf16>
    %cst_8 = arith.constant dense<0.000000e+00> : vector<8x512xf32>
    %12 = tpu.matmul %10, %11, %cst_8 {dimension_numbers = #tpu.dot_dimension_numbers<[1], [0], [0], [1], [0, 0, 1, 1], [], []>} : vector<8x256xbf16>, vector<256x512xbf16>, vector<8x512xf32> -> vector<8x512xf32>
    %c0_9 = arith.constant 0 : index
    %c0_10 = arith.constant 0 : index
    %13 = vector.load %arg5[%c0_9, %c0_10] : memref<1x512xf32, #tpu.memory_space<vmem>>, vector<1x512xf32>
    %14 = vector.broadcast %13 : vector<1x512xf32> to vector<8x512xf32>
    %15 = arith.addf %12, %14 : vector<8x512xf32>
    %cst_11 = arith.constant dense<0.000000e+00> : vector<512xf32>
    %16 = vector.multi_reduction <add>, %15, %cst_11 [0] : vector<8x512xf32> to vector<512xf32>
    %17 = vector.shape_cast %16 : vector<512xf32> to vector<1x512xf32>
    %cst_12 = arith.constant 8.000000e+00 : f32
    %18 = vector.broadcast %cst_12 : f32 to vector<1x512xf32>
    %19 = arith.divf %17, %18 : vector<1x512xf32>
    %20 = arith.mulf %15, %15 : vector<8x512xf32>
    %cst_13 = arith.constant dense<0.000000e+00> : vector<512xf32>
    %21 = vector.multi_reduction <add>, %20, %cst_13 [0] : vector<8x512xf32> to vector<512xf32>
    %22 = vector.shape_cast %21 : vector<512xf32> to vector<1x512xf32>
    %cst_14 = arith.constant 8.000000e+00 : f32
    %23 = vector.broadcast %cst_14 : f32 to vector<1x512xf32>
    %24 = arith.divf %22, %23 : vector<1x512xf32>
    %25 = arith.mulf %19, %19 : vector<1x512xf32>
    %26 = arith.subf %24, %25 : vector<1x512xf32>
    %cst_15 = arith.constant 0.000000e+00 : f32
    %27 = vector.broadcast %cst_15 : f32 to vector<1x512xf32>
    %28 = arith.maximumf %26, %27 : vector<1x512xf32>
    %c0_16 = arith.constant 0 : index
    %c0_17 = arith.constant 0 : index
    %29 = vector.load %arg6[%c0_16, %c0_17] : memref<1x512xf32, #tpu.memory_space<vmem>>, vector<1x512xf32>
    %cst_18 = arith.constant 9.99999974E-6 : f32
    %30 = vector.broadcast %cst_18 : f32 to vector<1x512xf32>
    %31 = arith.addf %28, %30 : vector<1x512xf32>
    %32 = math.rsqrt %31 : vector<1x512xf32>
    %33 = arith.mulf %29, %32 : vector<1x512xf32>
    %c0_19 = arith.constant 0 : index
    %c0_20 = arith.constant 0 : index
    %34 = vector.load %arg7[%c0_19, %c0_20] : memref<1x512xf32, #tpu.memory_space<vmem>>, vector<1x512xf32>
    %35 = arith.mulf %19, %33 : vector<1x512xf32>
    %36 = arith.subf %34, %35 : vector<1x512xf32>
    %37 = vector.broadcast %33 : vector<1x512xf32> to vector<8x512xf32>
    %38 = arith.mulf %15, %37 : vector<8x512xf32>
    %39 = vector.broadcast %36 : vector<1x512xf32> to vector<8x512xf32>
    %40 = arith.addf %38, %39 : vector<8x512xf32>
    %cst_21 = arith.constant 0.000000e+00 : f32
    %41 = vector.broadcast %cst_21 : f32 to vector<8x512xf32>
    %42 = arith.maximumf %40, %41 : vector<8x512xf32>
    %43 = arith.truncf %42 : vector<8x512xf32> to vector<8x512xbf16>
    %c0_22 = arith.constant 0 : index
    %c0_23 = arith.constant 0 : index
    %44 = vector.load %arg8[%c0_22, %c0_23] : memref<512x896xbf16, #tpu.memory_space<vmem>>, vector<512x896xbf16>
    %cst_24 = arith.constant dense<0.000000e+00> : vector<8x896xf32>
    %45 = tpu.matmul %43, %44, %cst_24 {dimension_numbers = #tpu.dot_dimension_numbers<[1], [0], [0], [1], [0, 0, 1, 1], [], []>} : vector<8x512xbf16>, vector<512x896xbf16>, vector<8x896xf32> -> vector<8x896xf32>
    %c0_25 = arith.constant 0 : index
    %c0_26 = arith.constant 0 : index
    %46 = vector.load %arg9[%c0_25, %c0_26] : memref<1x896xf32, #tpu.memory_space<vmem>>, vector<1x896xf32>
    %47 = vector.broadcast %46 : vector<1x896xf32> to vector<8x896xf32>
    %48 = arith.addf %45, %47 : vector<8x896xf32>
    %49 = math.tanh %48 : vector<8x896xf32>
    %c0_27 = arith.constant 0 : index
    %c0_28 = arith.constant 0 : index
    %50 = vector.load %arg10[%c0_27, %c0_28] : memref<8x896xf32, #tpu.memory_space<vmem>>, vector<8x896xf32>
    tpu.vector_store %arg10[%c0_27, %c0_28], %49 {strides = array<i32>} : memref<8x896xf32, #tpu.memory_space<vmem>>, vector<8x896xf32>,
    return
  }
  func.func @transform_0(%arg0: i32) -> (i32, i32) {
    %c0_i32 = arith.constant 0 : i32
    %c0_i32_0 = arith.constant 0 : i32
    %c0_i32_1 = arith.constant 0 : i32
    return %c0_i32, %c0_i32_0 : i32, i32
  }
  func.func @transform_1(%arg0: i32) -> (i32, i32) {
    %c0_i32 = arith.constant 0 : i32
    %c0_i32_0 = arith.constant 0 : i32
    %c0_i32_1 = arith.constant 0 : i32
    return %c0_i32, %c0_i32_0 : i32, i32
  }
  func.func @transform_2(%arg0: i32) -> (i32, i32) {
    %c0_i32 = arith.constant 0 : i32
    %c0_i32_0 = arith.constant 0 : i32
    %c0_i32_1 = arith.constant 0 : i32
    return %c0_i32, %c0_i32_0 : i32, i32
  }
  func.func @transform_3(%arg0: i32) -> (i32, i32) {
    %c0_i32 = arith.constant 0 : i32
    %c0_i32_0 = arith.constant 0 : i32
    %c0_i32_1 = arith.constant 0 : i32
    return %c0_i32, %c0_i32_0 : i32, i32
  }
  func.func @transform_4(%arg0: i32) -> (i32, i32) {
    %c0_i32 = arith.constant 0 : i32
    %c0_i32_0 = arith.constant 0 : i32
    %c0_i32_1 = arith.constant 0 : i32
    return %c0_i32, %c0_i32_0 : i32, i32
  }
  func.func @transform_5(%arg0: i32) -> (i32, i32) {
    %c0_i32 = arith.constant 0 : i32
    %c0_i32_0 = arith.constant 0 : i32
    %c0_i32_1 = arith.constant 0 : i32
    return %c0_i32, %c0_i32_0 : i32, i32
  }
  func.func @transform_6(%arg0: i32) -> (i32, i32) {
    %c0_i32 = arith.constant 0 : i32
    %c0_i32_0 = arith.constant 0 : i32
    %c0_i32_1 = arith.constant 0 : i32
    return %c0_i32, %c0_i32_0 : i32, i32
  }
  func.func @transform_7(%arg0: i32) -> (i32, i32) {
    %c0_i32 = arith.constant 0 : i32
    %c0_i32_0 = arith.constant 0 : i32
    %c0_i32_1 = arith.constant 0 : i32
    return %c0_i32, %c0_i32_0 : i32, i32
  }
  func.func @transform_8(%arg0: i32) -> (i32, i32) {
    %c0_i32 = arith.constant 0 : i32
    %c0_i32_0 = arith.constant 0 : i32
    %c0_i32_1 = arith.constant 0 : i32
    return %c0_i32, %c0_i32_0 : i32, i32
  }
  func.func @transform_9(%arg0: i32) -> (i32, i32) {
    %c0_i32 = arith.constant 0 : i32
    %c0_i32_0 = arith.constant 0 : i32
    %c0_i32_1 = arith.constant 0 : i32
    return %c0_i32, %c0_i32_0 : i32, i32
  }
}

</mosaic_0001>

<bundles_post_ra>
// kernel: _forward_padded.1
= control target key start
LH: loop header
LB: loop body
LE: loop exit
PB: predicated region body
PF: predicated region fallthrough
CT: control target
= control target key end

     0   :  { %14 = vsyncpa [#allocation3], 0  ;;  %s3960_s0 = inlined_call_operand.hbm [shape: f32[8,100], index: 0, kind: input, shape index: {}]   ;;  %s3961_s1 = inlined_call_operand.hbm [shape: bf16[100,256], index: 1, kind: input, shape index: {}]   ;;  %s3962_s2 = inlined_call_operand.hbm [shape: f32[1,256], index: 2, kind: input, shape index: {}]   ;;  %s3963_s3 = inlined_call_operand.hbm [shape: bf16[256,512], index: 3, kind: input, shape index: {}]   ;;  %s3964_s4 = inlined_call_operand.vmem [shape: f32[1,512], index: 4, kind: input, shape index: {}]   ;;  %s3965_s5 = inlined_call_operand.vmem [shape: f32[1,512], index: 5, kind: input, shape index: {}]   ;;  %s3966_s6 = inlined_call_operand.vmem [shape: f32[1,512], index: 6, kind: input, shape index: {}]   ;;  %s3967_s7 = inlined_call_operand.hbm [shape: bf16[512,896], index: 7, kind: input, shape index: {}]   ;;  %s3968_s8 = inlined_call_operand.vmem [shape: f32[1,896], index: 8, kind: input, shape index: {}]   ;;  %s3969_s9 = inlined_call_operand.hbm [shape: f32[8,896], index: 9, kind: output, shape index: {}]  }
   0x1   :  { %15 = vsyncpa [#allocation6], 0 }
   0x2   :  { %16 = vsyncpa [#allocation9], 0 }
   0x3   :  { %17 = vsyncpa [#allocation4], 0  ;;  %s3721_s30 = smov [#allocation5]   ;;  %s3581_s13 = scalar_lea.hbm %s3961_s1, 1664 }
   0x4   :  { %s33_s10 = sshll.u32 %s3721_s30, 4  ;;  %p3582_p0 = scmp.ne.s32.totalorder %s3961_s1, %s3581_s13  ;;  %s34_s10 = int_to_ptr.vmem [resolvable:$true] %s33_s10 }
   0x5   :  { %p3585_p1 = scmp.lt.u32.totalorder %s3581_s13, %s3961_s1 }
   0x7   :  { %p3587_p2 = pnand %p3585_p1, %p3582_p0 }
   0x9   :  { %3590 = shalt.err (!%p3587_p2)
}
   0xa   :  { %s3591_s18 = scalar_lea.vmem %s34_s10, 1664  ;;  %p3596_p4 = scmp.lt.s32.totalorder %s34_s10, %s34_s10 }
   0xb   :  { %p3592_p3 = scmp.ne.s32.totalorder %s34_s10, %s3591_s18  ;;  %p3597_p5 = scmp.lt.s32.totalorder %s3591_s18, %s3591_s18 }
   0xd   :  { %p3598_p6 = por %p3597_p5, %p3596_p4 }
   0xf   :  { %p3599_p7 = pnand %p3598_p6, %p3592_p3 }
  0x11   :  { %3602 = shalt.err (!%p3599_p7)
}
  0x12   :  { %s3722_s19 = smov 128   ;;  %s3723_s20 = smov 8  }
  0x13   :  { %39 = dma.hbm_to_vmem [thread:$0]  %s3961_s1, 1664, %s34_s10, [#allocation6], %s3722_s19, %s3722_s19, %s3723_s20  }
  0x14   :  { %s3724_s23 = smov [#allocation8]   ;;  %s3603_s27 = scalar_lea.hbm %s3963_s3, 8192 }
  0x15   :  { %s55_s24 = sshll.u32 %s3724_s23, 4  ;;  %p3604_p8 = scmp.ne.s32.totalorder %s3963_s3, %s3603_s27  ;;  %s56_s24 = int_to_ptr.vmem [resolvable:$true] %s55_s24 }
  0x16   :  { %p3607_p9 = scmp.lt.u32.totalorder %s3603_s27, %s3963_s3 }
  0x18   :  { %p3609_p10 = pnand %p3607_p9, %p3604_p8 }
  0x1a   :  { %3612 = shalt.err (!%p3609_p10)
}
  0x1b   :  { %s3613_s12 = scalar_lea.vmem %s56_s24, 8192  ;;  %p3618_p12 = scmp.lt.s32.totalorder %s56_s24, %s56_s24 }
  0x1c   :  { %p3614_p11 = scmp.ne.s32.totalorder %s56_s24, %s3613_s12  ;;  %p3619_p13 = scmp.lt.s32.totalorder %s3613_s12, %s3613_s12 }
  0x1e   :  { %p3620_p0 = por %p3619_p13, %p3618_p12 }
  0x20   :  { %p3621_p1 = pnand %p3620_p0, %p3614_p11 }
  0x22   :  { %3624 = shalt.err (!%p3621_p1)
}
  0x23   :  { %s3725_s1 = smov 256   ;;  %s3726_s10 = smov 16  }
  0x24   :  { %61 = dma.hbm_to_vmem [thread:$0]  %s3963_s3, 8192, %s56_s24, [#allocation9], %s3725_s1, %s3725_s1, %s3726_s10  }
  0x25   :  { %s3727_s15 = smov [#allocation2]   ;;  %s3728_s17 = smov [#allocation7]  }
  0x26   :  { %s24_s16 = sshll.u32 %s3727_s15, 4  ;;  %s46_s18 = sshll.u32 %s3728_s17, 4  ;;  %s25_s16 = int_to_ptr.vmem [resolvable:$true] %s24_s16  ;;  %s47_s18 = int_to_ptr.vmem [resolvable:$true] %s46_s18 }
  0x27   :  { %s3625_s21 = scalar_lea.hbm %s3960_s0, 128 }
  0x28   :  { %p3626_p2 = scmp.ne.s32.totalorder %s3960_s0, %s3625_s21  ;;  %p3629_p3 = scmp.lt.u32.totalorder %s3625_s21, %s3960_s0 }
  0x2a   :  { %p3631_p4 = pnand %p3629_p3, %p3626_p2 }
  0x2c   :  { %3634 = shalt.err (!%p3631_p4)
}
  0x2d   :  { %s3635_s3 = scalar_lea.vmem %s25_s16, 128  ;;  %p3640_p6 = scmp.lt.s32.totalorder %s25_s16, %s25_s16 }
  0x2e   :  { %p3636_p5 = scmp.ne.s32.totalorder %s25_s16, %s3635_s3  ;;  %p3641_p7 = scmp.lt.s32.totalorder %s3635_s3, %s3635_s3 }
  0x30   :  { %p3642_p8 = por %p3641_p7, %p3640_p6 }
  0x32   :  { %p3643_p9 = pnand %p3642_p8, %p3636_p5 }
  0x34   :  { %3646 = shalt.err (!%p3643_p9)
}
  0x35   :  { %27 = dma.hbm_to_vmem [thread:$0]  %s3960_s0, 128, %s25_s16, [#allocation3]  }
  0x36   :  { %s3647_s30 = scalar_lea.hbm %s3962_s2, 32 }
  0x37   :  { %p3648_p10 = scmp.ne.s32.totalorder %s3962_s2, %s3647_s30  ;;  %p3651_p11 = scmp.lt.u32.totalorder %s3647_s30, %s3962_s2 }
  0x39   :  { %p3653_p12 = pnand %p3651_p11, %p3648_p10 }
  0x3b   :  { %3656 = shalt.err (!%p3653_p12)
}
  0x3c   :  { %s3657_s13 = scalar_lea.vmem %s47_s18, 32  ;;  %p3662_p0 = scmp.lt.s32.totalorder %s47_s18, %s47_s18 }
  0x3d   :  { %p3658_p13 = scmp.ne.s32.totalorder %s47_s18, %s3657_s13  ;;  %p3663_p1 = scmp.lt.s32.totalorder %s3657_s13, %s3657_s13 }
  0x3f   :  { %p3664_p2 = por %p3663_p1, %p3662_p0 }
  0x41   :  { %p3665_p3 = pnand %p3664_p2, %p3658_p13 }
  0x43   :  { %3668 = shalt.err (!%p3665_p3)
}
  0x44   :  { %49 = dma.hbm_to_vmem [thread:$0]  %s3962_s2, 32, %s47_s18, [#allocation6]  }
  0x45   :  { %s3729_s15 = smov [#allocation10]   ;;  %s3669_s20 = scalar_lea.hbm %s3967_s7, 28672 }
  0x46   :  { %s73_s16 = sshll.u32 %s3729_s15, 4  ;;  %p3670_p4 = scmp.ne.s32.totalorder %s3967_s7, %s3669_s20  ;;  %s74_s16 = int_to_ptr.vmem [resolvable:$true] %s73_s16 }
  0x47   :  { %p3673_p5 = scmp.lt.u32.totalorder %s3669_s20, %s3967_s7 }
  0x49   :  { %p3675_p6 = pnand %p3673_p5, %p3670_p4 }
  0x4b   :  { %3678 = shalt.err (!%p3675_p6)
}
  0x4c   :  { %s3679_s26 = scalar_lea.vmem %s74_s16, 28672  ;;  %p3684_p8 = scmp.lt.s32.totalorder %s74_s16, %s74_s16 }
  0x4d   :  { %p3680_p7 = scmp.ne.s32.totalorder %s74_s16, %s3679_s26  ;;  %p3685_p9 = scmp.lt.s32.totalorder %s3679_s26, %s3679_s26 }
  0x4f   :  { %p3686_p10 = por %p3685_p9, %p3684_p8 }
  0x51   :  { %p3687_p11 = pnand %p3686_p10, %p3680_p7 }
  0x53   :  { %3690 = shalt.err (!%p3687_p11)
}
  0x54   :  { %s3730_s2 = smov 448   ;;  %s3731_s18 = smov 28  }
  0x55   :  { %79 = dma.hbm_to_vmem [thread:$0]  %s3967_s7, 28672, %s74_s16, [#allocation9], %s3730_s2, %s3730_s2, %s3731_s18  }
  0x56   :  { %3713 = dma.done.wait [#allocation3], 128  }
  0x57   :  { %3714 = vsyncadd [#allocation3], 4294967168 }
  0x58   :  { %3715 = dma.done.wait [#allocation6], 1696  }
  0x59   :  { %3716 = vsyncadd [#allocation6], 4294965600 }
  0x5a   :  { %3717 = dma.done.wait [#allocation9], 36864  }
  0x5b   :  { %3718 = vsyncadd [#allocation9], 4294930432  ;;  %v3732_v0 = vmov 0   ;;  %v3123_v1 = vld [vmem:[#allocation5 + $0x4] ss:$8 sps:$4 sm:$0xff]   ;;  %vm194_vm0 = vcmask 1041408  }
  0x5c   :  { %233 = vmatprep.mubr.bf16.mxu0 %v3732_v0  ;;  %v3125_v2 = vld [vmem:[#allocation5] ss:$8 sps:$4 sm:$0xff]   ;;  %201 = vmatprep.subr.bf16.mxu0 %v3123_v1  ;;  %v3126_v3 = vld [vmem:[#allocation5 + $0x14] ss:$8 sps:$4 sm:$0xff]   ;;  %v3128_v4 = vld [vmem:[#allocation5 + $0x10] ss:$8 sps:$4 sm:$0xff]  }
  0x5d   :  { %202 = vmatpush1.bf16.msra.mxu0 %v3125_v2  ;;  %v3129_v5 = vld [vmem:[#allocation5 + $0x24] ss:$8 sps:$4 sm:$0xff]   ;;  %v3131_v6 = vld [vmem:[#allocation5 + $0x20] ss:$8 sps:$4 sm:$0xff]   ;;  %v3132_v7 = vld [vmem:[#allocation5 + $0x34] ss:$8 sps:$4 sm:$0xff]  }
  0x5e   :  { %203 = vmatprep.subr.bf16.mxu0 %v3126_v3  ;;  %v3143_v8 = vld [vmem:[#allocation8 + $0x4] ss:$16 sps:$4 sm:$0xff]   ;;  %v3148_v11 = vld [vmem:[#allocation8] ss:$16 sps:$4 sm:$0xff]   ;;  %v3147_v27 = vld [vmem:[#allocation8 + $0xc] ss:$16 sps:$4 sm:$0xff]  }
  0x5f   :  { %v3134_v9 = vld [vmem:[#allocation5 + $0x30] ss:$8 sps:$4 sm:$0xff]   ;;  %v3135_v10 = vld [vmem:[#allocation5 + $0x44] ss:$8 sps:$4 sm:$0xff]   ;;  %654 = vmatprep.subr.bf16.mxu1 %v3143_v8  ;;  %v3137_v15 = vld [vmem:[#allocation5 + $0x40] ss:$8 sps:$4 sm:$0xff]  }
  0x60   :  { %v3149_v12 = vld [vmem:[#allocation8 + $0x24] ss:$16 sps:$4 sm:$0xff]   ;;  %655 = vmatpush1.bf16.msra.mxu1 %v3148_v11  ;;  %v3154_v13 = vld [vmem:[#allocation8 + $0x20] ss:$16 sps:$4 sm:$0xff]   ;;  %vm190_vm1 = vcmask 818176  }
  0x61   :  { %204 = vmatpush1.bf16.msra.mxu0 %v3128_v4  ;;  %656 = vmatprep.subr.bf16.mxu1 %v3149_v12  ;;  %v3155_v14 = vld [vmem:[#allocation8 + $0x44] ss:$16 sps:$4 sm:$0xff]   ;;  %v3160_v18 = vld [vmem:[#allocation8 + $0x40] ss:$16 sps:$4 sm:$0xff]   ;;  %v3145_v31 = vld [vmem:[#allocation8 + $0x8] ss:$16 sps:$4 sm:$0xff]  }
  0x62   :  { %205 = vmatprep.subr.bf16.mxu0 %v3129_v5  ;;  %v3138_v16 = vld [vmem:[#allocation5 + $0x54] ss:$8 sps:$4 sm:$0xff]   ;;  %v112_v17 = vld [vmem:[#allocation5 + $0x60] sm:$0x33]  ;;  %v3140_v20 = vld [vmem:[#allocation5 + $0x50] ss:$8 sps:$4 sm:$0xff]  }
  0x63   :  { %v3161_v19 = vld [vmem:[#allocation8 + $0x64] ss:$16 sps:$4 sm:$0xff]   ;;  %v2756_v21 = vcombine.high %v112_v17, %v112_v17  ;;  %v2755_v22 = vcombine.low %v112_v17, %v112_v17  ;;  %v3166_v23 = vld [vmem:[#allocation8 + $0x60] ss:$16 sps:$4 sm:$0xff]   ;;  %v3153_v32 = vld [vmem:[#allocation8 + $0x2c] ss:$16 sps:$4 sm:$0xff]  }
  0x64   :  { %657 = vmatpush1.bf16.msra.mxu1 %v3154_v13  ;;  %v3167_v24 = vld [vmem:[#allocation8 + $0x84] ss:$16 sps:$4 sm:$0xff]   ;;  %v3172_v28 = vld [vmem:[#allocation8 + $0x80] ss:$16 sps:$4 sm:$0xff]   ;;  %v3151_v35 = vld [vmem:[#allocation8 + $0x28] ss:$16 sps:$4 sm:$0xff]  }
  0x65   :  { %206 = vmatpush1.bf16.msra.mxu0 %v3131_v6  ;;  %658 = vmatprep.subr.bf16.mxu1 %v3155_v14  ;;  %v98_v25 = vld [vmem:[#allocation2] sm:$0xff]  ;;  %v196_v26 = vsel %vm194_vm0, %v2755_v22, 0  ;;  %v3157_v39 = vld [vmem:[#allocation8 + $0x48] ss:$16 sps:$4 sm:$0xff]   ;;  %v113_v22 = vld [vmem:[#allocation7] sm:$0x3] }
  0x66   :  { %207 = vmatprep.subr.bf16.mxu0 %v3132_v7  ;;  %v99_v29 = vpack.c.bf16 %v98_v25, %v98_v25  ;;  %v3173_v30 = vld [vmem:[#allocation8 + $0xa4] ss:$16 sps:$4 sm:$0xff]   ;;  %v3178_v33 = vld [vmem:[#allocation8 + $0xa0] ss:$16 sps:$4 sm:$0xff]   ;;  %v3159_v36 = vld [vmem:[#allocation8 + $0x4c] ss:$16 sps:$4 sm:$0xff]  }
  0x67   :  { %v3179_v34 = vld [vmem:[#allocation8 + $0xc4] ss:$16 sps:$4 sm:$0xff]   ;;  %v3184_v37 = vld [vmem:[#allocation8 + $0xc0] ss:$16 sps:$4 sm:$0xff]   ;;  %v3165_v40 = vld [vmem:[#allocation8 + $0x6c] ss:$16 sps:$4 sm:$0xff]  }
  0x68   :  { %659 = vmatpush1.bf16.msra.mxu1 %v3160_v18  ;;  %v3185_v38 = vld [vmem:[#allocation8 + $0xe4] ss:$16 sps:$4 sm:$0xff]   ;;  %v3190_v41 = vld [vmem:[#allocation8 + $0xe0] ss:$16 sps:$4 sm:$0xff]   ;;  %v3163_v43 = vld [vmem:[#allocation8 + $0x68] ss:$16 sps:$4 sm:$0xff]  }
  0x69   :  { %208 = vmatpush1.bf16.msra.mxu0 %v3134_v9  ;;  %660 = vmatprep.subr.bf16.mxu1 %v3161_v19  ;;  %v3191_v42 = vld [vmem:[#allocation8 + $0x104] ss:$16 sps:$4 sm:$0xff]   ;;  %v3171_v44 = vld [vmem:[#allocation8 + $0x8c] ss:$16 sps:$4 sm:$0xff]   ;;  %v3196_v45 = vld [vmem:[#allocation8 + $0x100] ss:$16 sps:$4 sm:$0xff]   ;;  %v115_v19 = vlaneseq }
  0x6a   :  { %209 = vmatprep.subr.bf16.mxu0 %v3135_v10  ;;  %v3197_v46 = vld [vmem:[#allocation8 + $0x124] ss:$16 sps:$4 sm:$0xff]   ;;  %v3169_v47 = vld [vmem:[#allocation8 + $0x88] ss:$16 sps:$4 sm:$0xff]   ;;  %v3177_v48 = vld [vmem:[#allocation8 + $0xac] ss:$16 sps:$4 sm:$0xff]  }
  0x6b   :  { %v3175_v49 = vld [vmem:[#allocation8 + $0xa8] ss:$16 sps:$4 sm:$0xff]   ;;  %v3202_v50 = vld [vmem:[#allocation8 + $0x120] ss:$16 sps:$4 sm:$0xff]   ;;  %v3203_v51 = vld [vmem:[#allocation8 + $0x144] ss:$16 sps:$4 sm:$0xff]  }
  0x6c   :  { %661 = vmatpush1.bf16.msra.mxu1 %v3166_v23  ;;  %v3183_v52 = vld [vmem:[#allocation8 + $0xcc] ss:$16 sps:$4 sm:$0xff]   ;;  %v3208_v53 = vld [vmem:[#allocation8 + $0x140] ss:$16 sps:$4 sm:$0xff]   ;;  %v3209_v54 = vld [vmem:[#allocation8 + $0x164] ss:$16 sps:$4 sm:$0xff]  }
  0x6d   :  { %210 = vmatpush1.bf16.msra.mxu0 %v3137_v15  ;;  %662 = vmatprep.subr.bf16.mxu1 %v3167_v24  ;;  %v3181_v55 = vld [vmem:[#allocation8 + $0xc8] ss:$16 sps:$4 sm:$0xff]   ;;  %v3189_v56 = vld [vmem:[#allocation8 + $0xec] ss:$16 sps:$4 sm:$0xff]   ;;  %v3214_v57 = vld [vmem:[#allocation8 + $0x160] ss:$16 sps:$4 sm:$0xff]  }
  0x6e   :  { %211 = vmatprep.subr.bf16.mxu0 %v3138_v16  ;;  %v3215_v58 = vld [vmem:[#allocation8 + $0x184] ss:$16 sps:$4 sm:$0xff]   ;;  %v3187_v59 = vld [vmem:[#allocation8 + $0xe8] ss:$16 sps:$4 sm:$0xff]   ;;  %v3195_v60 = vld [vmem:[#allocation8 + $0x10c] ss:$16 sps:$4 sm:$0xff]  }
  0x6f   :  { %v3220_v61 = vld [vmem:[#allocation8 + $0x180] ss:$16 sps:$4 sm:$0xff]   ;;  %v3221_v62 = vld [vmem:[#allocation8 + $0x1a4] ss:$16 sps:$4 sm:$0xff]   ;;  %v3193_v63 = vld [vmem:[#allocation8 + $0x108] ss:$16 sps:$4 sm:$0xff]  }
  0x70   :  { %663 = vmatpush1.bf16.msra.mxu1 %v3172_v28  ;;  %v3201_v0 = vld [vmem:[#allocation8 + $0x12c] ss:$16 sps:$4 sm:$0xff]   ;;  %v3199_v1 = vld [vmem:[#allocation8 + $0x128] ss:$16 sps:$4 sm:$0xff]   ;;  %v3226_v10 = vld [vmem:[#allocation8 + $0x1a0] ss:$16 sps:$4 sm:$0xff]  }
  0x71   :  { %212 = vmatpush1.bf16.msra.mxu0 %v3140_v20  ;;  %664 = vmatprep.subr.bf16.mxu1 %v3173_v30  ;;  %v3207_v2 = vld [vmem:[#allocation8 + $0x14c] ss:$16 sps:$4 sm:$0xff]   ;;  %v3205_v3 = vld [vmem:[#allocation8 + $0x148] ss:$16 sps:$4 sm:$0xff]   ;;  %v3227_v11 = vld [vmem:[#allocation8 + $0x1c4] ss:$16 sps:$4 sm:$0xff]  }
  0x72   :  { %2757 = vmatprep.subr.msk.bf16.mxu0 %vm194_vm0, %v2756_v21  ;;  %v3213_v4 = vld [vmem:[#allocation8 + $0x16c] ss:$16 sps:$4 sm:$0xff]   ;;  %v3211_v5 = vld [vmem:[#allocation8 + $0x168] ss:$16 sps:$4 sm:$0xff]   ;;  %v3232_v14 = vld [vmem:[#allocation8 + $0x1c0] ss:$16 sps:$4 sm:$0xff]  }
  0x73   :  { %v3219_v6 = vld [vmem:[#allocation8 + $0x18c] ss:$16 sps:$4 sm:$0xff]   ;;  %v3217_v7 = vld [vmem:[#allocation8 + $0x188] ss:$16 sps:$4 sm:$0xff]   ;;  %v3233_v15 = vld [vmem:[#allocation8 + $0x1e4] ss:$16 sps:$4 sm:$0xff]  }
  0x74   :  { %665 = vmatpush1.bf16.msra.mxu1 %v3178_v33  ;;  %v3225_v8 = vld [vmem:[#allocation8 + $0x1ac] ss:$16 sps:$4 sm:$0xff]   ;;  %v3223_v9 = vld [vmem:[#allocation8 + $0x1a8] ss:$16 sps:$4 sm:$0xff]   ;;  %v3238_v18 = vld [vmem:[#allocation8 + $0x1e0] ss:$16 sps:$4 sm:$0xff]  }
  0x75   :  { %214 = vmatpush1.bf16.msra.mxu0 %v196_v26  ;;  %666 = vmatprep.subr.bf16.mxu1 %v3179_v34  ;;  %v3231_v12 = vld [vmem:[#allocation8 + $0x1cc] ss:$16 sps:$4 sm:$0xff]   ;;  %v3229_v13 = vld [vmem:[#allocation8 + $0x1c8] ss:$16 sps:$4 sm:$0xff]   ;;  %v3845_v20 = vshrl.u32 %v115_v19, 7 }
  0x76   :  { %695 = vmatprep.subr.bf16.mxu0 %v3147_v27  ;;  %v3237_v16 = vld [vmem:[#allocation8 + $0x1ec] ss:$16 sps:$4 sm:$0xff]   ;;  %v3235_v17 = vld [vmem:[#allocation8 + $0x1e8] ss:$16 sps:$4 sm:$0xff]   ;;  %v3310_v19 = vld [vmem:[#allocation10 + $0x274] ss:$28 sps:$4 sm:$0xff]  }
  0x77   :  { %v3848_v21 = vsub.s32 0, %v3845_v20  ;;  %v3851_v23 = vsub.s32 1, %v3845_v20 }
  0x78   :  { %2758 = vmatmul.mubr.msk.bf16.vlgmr.msra.gmra.mrb[0].mxu0 %vm190_vm1, %v99_v29  ;;  %667 = vmatpush1.bf16.msra.mxu1 %v3184_v37 }
  0x79   :  { %696 = vmatpush1.bf16.msra.mxu0 %v3145_v31  ;;  %668 = vmatprep.subr.bf16.mxu1 %v3185_v38  ;;  %v118_v24 = vrot.slane %v113_v22, %v3848_v21  ;;  %v122_v25 = vrot.slane %v113_v22, %v3851_v23  ;;  %v3241_v38 = vld [vmem:[#allocation10 + $0x4] ss:$28 sps:$4 sm:$0xff]  }
  0x7a   :  { %697 = vmatprep.subr.bf16.mxu0 %v3153_v32  ;;  %v3305_v22 = vld [vmem:[#allocation10 + $0x268] ss:$28 sps:$4 sm:$0xff]  }
  0x7c   :  { %669 = vmatpush1.bf16.msra.mxu1 %v3190_v41  ;;  %v3242_v41 = vld [vmem:[#allocation10 + $0x8] ss:$28 sps:$4 sm:$0xff]  }
  0x7d   :  { %698 = vmatpush1.bf16.msra.mxu0 %v3151_v35  ;;  %670 = vmatprep.subr.bf16.mxu1 %v3191_v42  ;;  %v3247_v42 = vld [vmem:[#allocation10 + $0x3c] ss:$28 sps:$4 sm:$0xff]  }
  0x7e   :  { %699 = vmatprep.subr.bf16.mxu0 %v3159_v36 }
  0x80   :  { %671 = vmatpush1.bf16.msra.mxu1 %v3196_v45  ;;  %v3248_v45 = vld [vmem:[#allocation10 + $0x40] ss:$28 sps:$4 sm:$0xff]  }
  0x81   :  { %700 = vmatpush1.bf16.msra.mxu0 %v3157_v39  ;;  %672 = vmatprep.subr.bf16.mxu1 %v3197_v46  ;;  %v3244_v39 = vld [vmem:[#allocation10 + $0xc] ss:$28 sps:$4 sm:$0xff]   ;;  %v3253_v46 = vld [vmem:[#allocation10 + $0x74] ss:$28 sps:$4 sm:$0xff]  }
  0x82   :  { %701 = vmatprep.subr.bf16.mxu0 %v3165_v40  ;;  %v3239_v40 = vld [vmem:[#allocation10] ss:$28 sps:$4 sm:$0xff]  }
  0x84   :  { %673 = vmatpush1.bf16.msra.mxu1 %v3202_v50  ;;  %v3259_v50 = vld [vmem:[#allocation10 + $0xac] ss:$28 sps:$4 sm:$0xff]  }
  0x85   :  { %702 = vmatpush1.bf16.msra.mxu0 %v3163_v43  ;;  %674 = vmatprep.subr.bf16.mxu1 %v3203_v51  ;;  %v3250_v43 = vld [vmem:[#allocation10 + $0x44] ss:$28 sps:$4 sm:$0xff]   ;;  %v3262_v51 = vld [vmem:[#allocation10 + $0xb4] ss:$28 sps:$4 sm:$0xff]  }
  0x86   :  { %703 = vmatprep.subr.bf16.mxu0 %v3171_v44  ;;  %v3245_v44 = vld [vmem:[#allocation10 + $0x38] ss:$28 sps:$4 sm:$0xff]  }
  0x88   :  { %675 = vmatpush1.bf16.msra.mxu1 %v3208_v53  ;;  %v3260_v53 = vld [vmem:[#allocation10 + $0xb0] ss:$28 sps:$4 sm:$0xff]  }
  0x89   :  { %704 = vmatpush1.bf16.msra.mxu0 %v3169_v47  ;;  %676 = vmatprep.subr.bf16.mxu1 %v3209_v54  ;;  %v3256_v47 = vld [vmem:[#allocation10 + $0x7c] ss:$28 sps:$4 sm:$0xff]   ;;  %v3265_v54 = vld [vmem:[#allocation10 + $0xe4] ss:$28 sps:$4 sm:$0xff]  }
  0x8a   :  { %705 = vmatprep.subr.bf16.mxu0 %v3177_v48  ;;  %v3251_v48 = vld [vmem:[#allocation10 + $0x70] ss:$28 sps:$4 sm:$0xff]  }
  0x8c   :  { %677 = vmatpush1.bf16.msra.mxu1 %v3214_v57  ;;  %v3266_v57 = vld [vmem:[#allocation10 + $0xe8] ss:$28 sps:$4 sm:$0xff]  }
  0x8d   :  { %706 = vmatpush1.bf16.msra.mxu0 %v3175_v49  ;;  %678 = vmatprep.subr.bf16.mxu1 %v3215_v58  ;;  %v3254_v49 = vld [vmem:[#allocation10 + $0x78] ss:$28 sps:$4 sm:$0xff]  }
  0x8e   :  { %707 = vmatprep.subr.bf16.mxu0 %v3183_v52  ;;  %v3257_v52 = vld [vmem:[#allocation10 + $0xa8] ss:$28 sps:$4 sm:$0xff]   ;;  %v3271_v58 = vld [vmem:[#allocation10 + $0x11c] ss:$28 sps:$4 sm:$0xff]  }
  0x90   :  { %679 = vmatpush1.bf16.msra.mxu1 %v3220_v61  ;;  %v3272_v61 = vld [vmem:[#allocation10 + $0x120] ss:$28 sps:$4 sm:$0xff]  }
  0x91   :  { %708 = vmatpush1.bf16.msra.mxu0 %v3181_v55  ;;  %680 = vmatprep.subr.bf16.mxu1 %v3221_v62  ;;  %v3268_v55 = vld [vmem:[#allocation10 + $0xec] ss:$28 sps:$4 sm:$0xff]   ;;  %v3277_v62 = vld [vmem:[#allocation10 + $0x154] ss:$28 sps:$4 sm:$0xff]  }
  0x92   :  { %709 = vmatprep.subr.bf16.mxu0 %v3189_v56  ;;  %v3263_v56 = vld [vmem:[#allocation10 + $0xe0] ss:$28 sps:$4 sm:$0xff]  }
  0x94   :  { %681 = vmatpush1.bf16.msra.mxu1 %v3226_v10  ;;  %v3295_v10 = vld [vmem:[#allocation10 + $0x1fc] ss:$28 sps:$4 sm:$0xff]  }
  0x95   :  { %710 = vmatpush1.bf16.msra.mxu0 %v3187_v59  ;;  %682 = vmatprep.subr.bf16.mxu1 %v3227_v11  ;;  %v3274_v59 = vld [vmem:[#allocation10 + $0x124] ss:$28 sps:$4 sm:$0xff]  }
  0x96   :  { %711 = vmatprep.subr.bf16.mxu0 %v3195_v60  ;;  %v3269_v60 = vld [vmem:[#allocation10 + $0x118] ss:$28 sps:$4 sm:$0xff]   ;;  %v3298_v11 = vld [vmem:[#allocation10 + $0x204] ss:$28 sps:$4 sm:$0xff]  }
  0x98   :  { %683 = vmatpush1.bf16.msra.mxu1 %v3232_v14  ;;  %v3301_v14 = vld [vmem:[#allocation10 + $0x234] ss:$28 sps:$4 sm:$0xff]  }
  0x99   :  { %712 = vmatpush1.bf16.msra.mxu0 %v3193_v63  ;;  %684 = vmatprep.subr.bf16.mxu1 %v3233_v15  ;;  %v3280_v63 = vld [vmem:[#allocation10 + $0x15c] ss:$28 sps:$4 sm:$0xff]  }
  0x9a   :  { %713 = vmatprep.subr.bf16.mxu0 %v3201_v0  ;;  %v3275_v0 = vld [vmem:[#allocation10 + $0x150] ss:$28 sps:$4 sm:$0xff]   ;;  %v3304_v15 = vld [vmem:[#allocation10 + $0x23c] ss:$28 sps:$4 sm:$0xff]  }
  0x9c   :  { %685 = vmatpush1.bf16.msra.mxu1 %v3238_v18  ;;  %v3307_v18 = vld [vmem:[#allocation10 + $0x26c] ss:$28 sps:$4 sm:$0xff]  }
  0x9d   :  { %714 = vmatpush1.bf16.msra.mxu0 %v3199_v1  ;;  %2386 = vmatprep.subr.bf16.mxu1 %v3241_v38  ;;  %v3278_v1 = vld [vmem:[#allocation10 + $0x158] ss:$28 sps:$4 sm:$0xff]  }
  0x9e   :  { %715 = vmatprep.subr.bf16.mxu0 %v3207_v2  ;;  %v3283_v2 = vld [vmem:[#allocation10 + $0x18c] ss:$28 sps:$4 sm:$0xff]   ;;  %v3334_v38 = vld [vmem:[#allocation10 + $0x354] ss:$28 sps:$4 sm:$0xff]  }
  0xa1   :  { %716 = vmatpush1.bf16.msra.mxu0 %v3205_v3  ;;  %v3286_v3 = vld [vmem:[#allocation10 + $0x194] ss:$28 sps:$4 sm:$0xff]  }
  0xa2   :  { %717 = vmatprep.subr.bf16.mxu0 %v3213_v4  ;;  %v3281_v4 = vld [vmem:[#allocation10 + $0x188] ss:$28 sps:$4 sm:$0xff]  }
  0xa5   :  { %718 = vmatpush1.bf16.msra.mxu0 %v3211_v5  ;;  %v3284_v5 = vld [vmem:[#allocation10 + $0x190] ss:$28 sps:$4 sm:$0xff]  }
  0xa6   :  { %719 = vmatprep.subr.bf16.mxu0 %v3219_v6  ;;  %v3289_v6 = vld [vmem:[#allocation10 + $0x1c4] ss:$28 sps:$4 sm:$0xff]  }
  0xa9   :  { %720 = vmatpush1.bf16.msra.mxu0 %v3217_v7  ;;  %v3292_v7 = vld [vmem:[#allocation10 + $0x1cc] ss:$28 sps:$4 sm:$0xff]  }
  0xaa   :  { %721 = vmatprep.subr.bf16.mxu0 %v3225_v8  ;;  %v3287_v8 = vld [vmem:[#allocation10 + $0x1c0] ss:$28 sps:$4 sm:$0xff]  }
  0xad   :  { %722 = vmatpush1.bf16.msra.mxu0 %v3223_v9  ;;  %v3290_v9 = vld [vmem:[#allocation10 + $0x1c8] ss:$28 sps:$4 sm:$0xff]  }
  0xae   :  { %723 = vmatprep.subr.bf16.mxu0 %v3231_v12  ;;  %v3293_v12 = vld [vmem:[#allocation10 + $0x1f8] ss:$28 sps:$4 sm:$0xff]  }
  0xb1   :  { %724 = vmatpush1.bf16.msra.mxu0 %v3229_v13  ;;  %v3296_v13 = vld [vmem:[#allocation10 + $0x200] ss:$28 sps:$4 sm:$0xff]  }
  0xb2   :  { %725 = vmatprep.subr.bf16.mxu0 %v3237_v16  ;;  %v3299_v16 = vld [vmem:[#allocation10 + $0x230] ss:$28 sps:$4 sm:$0xff]  }
  0xb5   :  { %726 = vmatpush1.bf16.msra.mxu0 %v3235_v17  ;;  %v3302_v17 = vld [vmem:[#allocation10 + $0x238] ss:$28 sps:$4 sm:$0xff]  }
  0xb6   :  { %2468 = vmatprep.subr.bf16.mxu0 %v3244_v39  ;;  %v3329_v39 = vld [vmem:[#allocation10 + $0x348] ss:$28 sps:$4 sm:$0xff]  }
 0x14b   :  { %v235_v26 = vpop.f32.mrb[0].mxu0 }
 0x14c   :  { %v236_v27 = vadd.f32 %v235_v26, %v118_v24  ;;  %v237_v28 = vpop.f32.mrb[1].mxu0  ;;  %v3308_v24 = vld [vmem:[#allocation10 + $0x270] ss:$28 sps:$4 sm:$0xff]  }
 0x14d   :  { %v238_v29 = vadd.f32 %v237_v28, %v122_v25  ;;  %v239_v30 = vpop.f32.mrb[2].mxu0  ;;  %v3313_v25 = vld [vmem:[#allocation10 + $0x2a4] ss:$28 sps:$4 sm:$0xff]   ;;  %v3316_v26 = vld [vmem:[#allocation10 + $0x2ac] ss:$28 sps:$4 sm:$0xff]  }
 0x14e   :  { %v242_v31 = vmul.f32 0.2, %v236_v27  ;;  %v240_v32 = vpop.f32.mrb[3].mxu0  ;;  %v3314_v28 = vld [vmem:[#allocation10 + $0x2a8] ss:$28 sps:$4 sm:$0xff]  }
 0x14f   :  { %v243_v33 = vmul.f32 0.2, %v238_v29  ;;  %v3317_v30 = vld [vmem:[#allocation10 + $0x2d8] ss:$28 sps:$4 sm:$0xff]   ;;  %v3322_v32 = vld [vmem:[#allocation10 + $0x2e4] ss:$28 sps:$4 sm:$0xff]  }
 0x150   :  { %v244_v34 = vmax.f32 %v236_v27, %v242_v31  ;;  %v3311_v27 = vld [vmem:[#allocation10 + $0x2a0] ss:$28 sps:$4 sm:$0xff]  }
 0x151   :  { %v245_v35 = vmax.f32 %v238_v29, %v243_v33  ;;  %v3319_v29 = vld [vmem:[#allocation10 + $0x2dc] ss:$28 sps:$4 sm:$0xff]   ;;  %v3325_v33 = vld [vmem:[#allocation10 + $0x314] ss:$28 sps:$4 sm:$0xff]  }
 0x152   :  { %v246_v37 = vpack.c.bf16 %v244_v34, %v244_v34  ;;  %v3320_v31 = vld [vmem:[#allocation10 + $0x2e0] ss:$28 sps:$4 sm:$0xff]  }
 0x153   :  { %v247_v36 = vpack.c.bf16 %v245_v35, %v245_v35  ;;  %v3328_v34 = vld [vmem:[#allocation10 + $0x31c] ss:$28 sps:$4 sm:$0xff]   ;;  %v3323_v35 = vld [vmem:[#allocation10 + $0x310] ss:$28 sps:$4 sm:$0xff]  }
 0x155   :  { %686 = vmatprep.mubr.bf16.mxu1 %v247_v36  ;;  %727 = vmatprep.mubr.bf16.mxu0 %v247_v36  ;;  %v3326_v36 = vld [vmem:[#allocation10 + $0x318] ss:$28 sps:$4 sm:$0xff]  }
 0x156   :  { %687 = vmatmul.mubr.bf16.vlgmr.msra.gmra.mrb[0].mxu1 %v246_v37  ;;  %728 = vmatmul.mubr.bf16.vlgmr.msra.gmra.mrb[4].mxu0 %v246_v37  ;;  %v3331_v37 = vld [vmem:[#allocation10 + $0x34c] ss:$28 sps:$4 sm:$0xff]  }
 0x157   :  { %2387 = vmatpush1.bf16.msra.mxu1 %v3239_v40  ;;  %2469 = vmatpush1.bf16.msra.mxu0 %v3242_v41  ;;  %v3332_v40 = vld [vmem:[#allocation10 + $0x350] ss:$28 sps:$4 sm:$0xff]   ;;  %v3337_v41 = vld [vmem:[#allocation10 + $0x384] ss:$28 sps:$4 sm:$0xff]  }
 0x158   :  { %2388 = vmatprep.subr.bf16.mxu1 %v3247_v42  ;;  %2470 = vmatprep.subr.bf16.mxu0 %v3250_v43  ;;  %v3340_v42 = vld [vmem:[#allocation10 + $0x38c] ss:$28 sps:$4 sm:$0xff]   ;;  %v3856_v43 = vsub.s32 2, %v3845_v20 }
 0x15b   :  { %2389 = vmatpush1.bf16.msra.mxu1 %v3245_v44  ;;  %2471 = vmatpush1.bf16.msra.mxu0 %v3248_v45  ;;  %v312_v44 = vld [vmem:[%s3964_s4] sm:$0xf]  ;;  %v3862_v45 = vsub.s32 3, %v3845_v20 }
 0x15c   :  { %2390 = vmatprep.subr.bf16.mxu1 %v3253_v46  ;;  %2472 = vmatprep.subr.bf16.mxu0 %v3256_v47  ;;  %v317_v46 = vrot.slane %v312_v44, %v3848_v21  ;;  %v325_v47 = vrot.slane %v312_v44, %v3856_v43 }
 0x15f   :  { %2391 = vmatpush1.bf16.msra.mxu1 %v3251_v48  ;;  %2473 = vmatpush1.bf16.msra.mxu0 %v3254_v49  ;;  %v321_v48 = vrot.slane %v312_v44, %v3851_v23  ;;  %v329_v49 = vrot.slane %v312_v44, %v3862_v45 }
 0x160   :  { %2392 = vmatprep.subr.bf16.mxu1 %v3259_v50  ;;  %2474 = vmatprep.subr.bf16.mxu0 %v3262_v51 }
 0x163   :  { %2393 = vmatpush1.bf16.msra.mxu1 %v3257_v52  ;;  %2475 = vmatpush1.bf16.msra.mxu0 %v3260_v53 }
 0x164   :  { %2394 = vmatprep.subr.bf16.mxu1 %v3265_v54  ;;  %2476 = vmatprep.subr.bf16.mxu0 %v3268_v55 }
 0x167   :  { %2395 = vmatpush1.bf16.msra.mxu1 %v3263_v56  ;;  %2477 = vmatpush1.bf16.msra.mxu0 %v3266_v57 }
 0x168   :  { %2396 = vmatprep.subr.bf16.mxu1 %v3271_v58  ;;  %2478 = vmatprep.subr.bf16.mxu0 %v3274_v59 }
 0x16b   :  { %2397 = vmatpush1.bf16.msra.mxu1 %v3269_v60  ;;  %2479 = vmatpush1.bf16.msra.mxu0 %v3272_v61 }
 0x16c   :  { %2398 = vmatprep.subr.bf16.mxu1 %v3277_v62  ;;  %2480 = vmatprep.subr.bf16.mxu0 %v3280_v63 }
 0x16f   :  { %2399 = vmatpush1.bf16.msra.mxu1 %v3275_v0  ;;  %2481 = vmatpush1.bf16.msra.mxu0 %v3278_v1 }
 0x170   :  { %2400 = vmatprep.subr.bf16.mxu1 %v3283_v2  ;;  %2482 = vmatprep.subr.bf16.mxu0 %v3286_v3 }
 0x173   :  { %2401 = vmatpush1.bf16.msra.mxu1 %v3281_v4  ;;  %2483 = vmatpush1.bf16.msra.mxu0 %v3284_v5 }
 0x174   :  { %2402 = vmatprep.subr.bf16.mxu1 %v3289_v6  ;;  %2484 = vmatprep.subr.bf16.mxu0 %v3292_v7 }
 0x177   :  { %2403 = vmatpush1.bf16.msra.mxu1 %v3287_v8  ;;  %2485 = vmatpush1.bf16.msra.mxu0 %v3290_v9 }
 0x178   :  { %2404 = vmatprep.subr.bf16.mxu1 %v3295_v10  ;;  %2486 = vmatprep.subr.bf16.mxu0 %v3298_v11 }
 0x17b   :  { %2405 = vmatpush1.bf16.msra.mxu1 %v3293_v12  ;;  %2487 = vmatpush1.bf16.msra.mxu0 %v3296_v13 }
 0x17c   :  { %2406 = vmatprep.subr.bf16.mxu1 %v3301_v14  ;;  %2488 = vmatprep.subr.bf16.mxu0 %v3304_v15 }
 0x17f   :  { %2407 = vmatpush1.bf16.msra.mxu1 %v3299_v16  ;;  %2489 = vmatpush1.bf16.msra.mxu0 %v3302_v17 }
 0x180   :  { %2408 = vmatprep.subr.bf16.mxu1 %v3307_v18  ;;  %2490 = vmatprep.subr.bf16.mxu0 %v3310_v19 }
 0x183   :  { %2409 = vmatpush1.bf16.msra.mxu1 %v3305_v22  ;;  %2491 = vmatpush1.bf16.msra.mxu0 %v3308_v24 }
 0x184   :  { %2410 = vmatprep.subr.bf16.mxu1 %v3313_v25  ;;  %2492 = vmatprep.subr.bf16.mxu0 %v3316_v26 }
 0x187   :  { %2411 = vmatpush1.bf16.msra.mxu1 %v3311_v27  ;;  %2493 = vmatpush1.bf16.msra.mxu0 %v3314_v28 }
 0x188   :  { %2412 = vmatprep.subr.bf16.mxu1 %v3319_v29  ;;  %2494 = vmatprep.subr.bf16.mxu0 %v3322_v32 }
 0x18b   :  { %2413 = vmatpush1.bf16.msra.mxu1 %v3317_v30  ;;  %2495 = vmatpush1.bf16.msra.mxu0 %v3320_v31 }
 0x18c   :  { %2414 = vmatprep.subr.bf16.mxu1 %v3325_v33  ;;  %2496 = vmatprep.subr.bf16.mxu0 %v3328_v34 }
 0x18f   :  { %2415 = vmatpush1.bf16.msra.mxu1 %v3323_v35  ;;  %2497 = vmatpush1.bf16.msra.mxu0 %v3326_v36 }
 0x190   :  { %2416 = vmatprep.subr.bf16.mxu1 %v3331_v37  ;;  %2498 = vmatprep.subr.bf16.mxu0 %v3334_v38 }
 0x193   :  { %2417 = vmatpush1.bf16.msra.mxu1 %v3329_v39  ;;  %2499 = vmatpush1.bf16.msra.mxu0 %v3332_v40 }
 0x194   :  { %2427 = vmatprep.subr.bf16.mxu1 %v3337_v41  ;;  %2509 = vmatprep.subr.bf16.mxu0 %v3340_v42 }
 0x229   :  { %v688_v50 = vpop.f32.mrb[0].mxu1  ;;  %v729_v51 = vpop.f32.mrb[4].mxu0 }
 0x22a   :  { %v3868_v52 = vadd.f32 %v688_v50, %v317_v46  ;;  %v3870_v53 = vadd.f32 %v729_v51, %v325_v47  ;;  %v690_v54 = vpop.f32.mrb[1].mxu1  ;;  %v731_v55 = vpop.f32.mrb[5].mxu0 }
 0x22b   :  { %v3872_v56 = vadd.f32 %v690_v54, %v321_v48  ;;  %v3874_v57 = vadd.f32 %v731_v55, %v329_v49  ;;  %v692_v58 = vpop.f32.mrb[2].mxu1  ;;  %v733_v59 = vpop.f32.mrb[6].mxu0 }
 0x22c   :  { %v736_v60 = vrot.slane %v3868_v52, 4  ;;  %v765_v61 = vmul.f32 %v3868_v52, %v3868_v52  ;;  %v748_v62 = vrot.slane %v3870_v53, 4  ;;  %v767_v63 = vmul.f32 %v3870_v53, %v3870_v53  ;;  %v693_v0 = vpop.f32.mrb[3].mxu1  ;;  %v734_v1 = vpop.f32.mrb[7].mxu0 }
 0x22d   :  { %v742_v2 = vrot.slane %v3872_v56, 4  ;;  %v766_v3 = vmul.f32 %v3872_v56, %v3872_v56  ;;  %v754_v4 = vrot.slane %v3874_v57, 4  ;;  %v768_v5 = vmul.f32 %v3874_v57, %v3874_v57 }
 0x22e   :  { %v737_v6 = vadd.f32 %v736_v60, %v3868_v52  ;;  %v769_v7 = vrot.slane %v765_v61, 4  ;;  %v749_v8 = vadd.f32 %v748_v62, %v3870_v53  ;;  %v781_v9 = vrot.slane %v767_v63, 4 }
 0x22f   :  { %v743_v10 = vadd.f32 %v742_v2, %v3872_v56  ;;  %v775_v11 = vrot.slane %v766_v3, 4  ;;  %v755_v12 = vadd.f32 %v754_v4, %v3874_v57  ;;  %v787_v13 = vrot.slane %v768_v5, 4 }
 0x230   :  { %v738_v14 = vrot.slane %v737_v6, 2  ;;  %v770_v15 = vadd.f32 %v769_v7, %v765_v61  ;;  %v750_v16 = vrot.slane %v749_v8, 2  ;;  %v782_v17 = vadd.f32 %v781_v9, %v767_v63 }
 0x231   :  { %v744_v18 = vrot.slane %v743_v10, 2  ;;  %v776_v19 = vadd.f32 %v775_v11, %v766_v3  ;;  %v756_v22 = vrot.slane %v755_v12, 2  ;;  %v788_v24 = vadd.f32 %v787_v13, %v768_v5 }
 0x232   :  { %v739_v25 = vadd.f32 %v738_v14, %v737_v6  ;;  %v771_v26 = vrot.slane %v770_v15, 2  ;;  %v751_v27 = vadd.f32 %v750_v16, %v749_v8  ;;  %v783_v28 = vrot.slane %v782_v17, 2 }
 0x233   :  { %v745_v29 = vadd.f32 %v744_v18, %v743_v10  ;;  %v777_v30 = vrot.slane %v776_v19, 2  ;;  %v757_v31 = vadd.f32 %v756_v22, %v755_v12  ;;  %v789_v32 = vrot.slane %v788_v24, 2 }
 0x234   :  { %v740_v33 = vrot.slane %v739_v25, 1  ;;  %v772_v34 = vadd.f32 %v771_v26, %v770_v15  ;;  %v752_v35 = vrot.slane %v751_v27, 1  ;;  %v784_v36 = vadd.f32 %v783_v28, %v782_v17 }
 0x235   :  { %v746_v37 = vrot.slane %v745_v29, 1  ;;  %v778_v38 = vadd.f32 %v777_v30, %v776_v19  ;;  %v758_v39 = vrot.slane %v757_v31, 1  ;;  %v790_v40 = vadd.f32 %v789_v32, %v788_v24 }
 0x236   :  { %v741_v41 = vadd.f32 %v740_v33, %v739_v25  ;;  %v773_v42 = vrot.slane %v772_v34, 1  ;;  %v753_v44 = vadd.f32 %v752_v35, %v751_v27  ;;  %v785_v46 = vrot.slane %v784_v36, 1  ;;  %v809_v35 = vld [vmem:[%s3965_s5] sm:$0xf] }
 0x237   :  { %v747_v47 = vadd.f32 %v746_v37, %v745_v29  ;;  %v779_v48 = vrot.slane %v778_v38, 1  ;;  %v759_v49 = vadd.f32 %v758_v39, %v757_v31  ;;  %v791_v50 = vrot.slane %v790_v40, 1 }
 0x238   :  { %v761_v51 = vmul.f32 0.125, %v741_v41  ;;  %v774_v54 = vadd.f32 %v773_v42, %v772_v34  ;;  %v763_v55 = vmul.f32 0.125, %v753_v44  ;;  %v786_v58 = vadd.f32 %v785_v46, %v784_v36 }
 0x239   :  { %v762_v59 = vmul.f32 0.125, %v747_v47  ;;  %v780_v60 = vadd.f32 %v779_v48, %v778_v38  ;;  %v764_v61 = vmul.f32 0.125, %v759_v49  ;;  %v792_v62 = vadd.f32 %v791_v50, %v790_v40 }
 0x23a   :  { %v793_v63 = vmul.f32 0.125, %v774_v54  ;;  %v797_v0 = vmul.f32 %v761_v51, %v761_v51  ;;  %v795_v1 = vmul.f32 0.125, %v786_v58  ;;  %v799_v2 = vmul.f32 %v763_v55, %v763_v55 }
 0x23b   :  { %v794_v3 = vmul.f32 0.125, %v780_v60  ;;  %v798_v4 = vmul.f32 %v762_v59, %v762_v59  ;;  %v796_v5 = vmul.f32 0.125, %v792_v62  ;;  %v800_v6 = vmul.f32 %v764_v61, %v764_v61 }
 0x23c   :  { %v801_v7 = vsub.f32 %v793_v63, %v797_v0  ;;  %v803_v8 = vsub.f32 %v795_v1, %v799_v2  ;;  %v3733_v19 = vmov 1966171168  }
 0x23d   :  { %v802_v9 = vsub.f32 %v794_v3, %v798_v4  ;;  %v804_v10 = vsub.f32 %v796_v5, %v800_v6  ;;  %v825_v22 = vunpack.c.l.s4 %v3733_v19  ;;  %v3350_v19 = vld [vmem:[#allocation10 + $0x3f8] ss:$28 sps:$4 sm:$0xff]  }
 0x23e   :  { %v805_v11 = vmax.f32 %v801_v7, 0.0  ;;  %v807_v12 = vmax.f32 %v803_v8, 0.0  ;;  %v3335_v8 = vld [vmem:[#allocation10 + $0x380] ss:$28 sps:$4 sm:$0xff]  }
 0x23f   :  { %v806_v13 = vmax.f32 %v802_v9, 0.0  ;;  %v808_v14 = vmax.f32 %v804_v10, 0.0  ;;  %v826_v24 = vunpack.c.0.s8 %v825_v22  ;;  %v3338_v9 = vld [vmem:[#allocation10 + $0x388] ss:$28 sps:$4 sm:$0xff]  }
 0x240   :  { %v810_v15 = vadd.f32 1e-05, %v805_v11  ;;  %v812_v16 = vadd.f32 1e-05, %v807_v12  ;;  %v3343_v11 = vld [vmem:[#allocation10 + $0x3bc] ss:$28 sps:$4 sm:$0xff]  }
 0x241   :  { %v811_v17 = vadd.f32 1e-05, %v806_v13  ;;  %v813_v18 = vadd.f32 1e-05, %v808_v14  ;;  %v829_v27 = vsub.s32 %v826_v24, %v3845_v20  ;;  %v3346_v12 = vld [vmem:[#allocation10 + $0x3c4] ss:$28 sps:$4 sm:$0xff]  }
 0x242   :  { %3559 = vrsqrt.f32 %v810_v15  ;;  %v3341_v14 = vld [vmem:[#allocation10 + $0x3b8] ss:$28 sps:$4 sm:$0xff]   ;;  %v3344_v15 = vld [vmem:[#allocation10 + $0x3c0] ss:$28 sps:$4 sm:$0xff]   ;;  %v3355_v22 = vld [vmem:[#allocation10 + $0x42c] ss:$28 sps:$4 sm:$0xff]  }
 0x243   :  { %3561 = vrsqrt.f32 %v812_v16  ;;  %v3349_v16 = vld [vmem:[#allocation10 + $0x3f4] ss:$28 sps:$4 sm:$0xff]  }
 0x244   :  { %3563 = vrsqrt.f32 %v811_v17  ;;  %v3352_v17 = vld [vmem:[#allocation10 + $0x3fc] ss:$28 sps:$4 sm:$0xff]   ;;  %v3358_v24 = vld [vmem:[#allocation10 + $0x434] ss:$28 sps:$4 sm:$0xff]  }
 0x245   :  { %3565 = vrsqrt.f32 %v813_v18  ;;  %v3347_v18 = vld [vmem:[#allocation10 + $0x3f0] ss:$28 sps:$4 sm:$0xff]  }
 0x24c   :  { %v3560_v25 = vpop.eup %3559 }
 0x24d   :  { %v3562_v26 = vpop.eup %3561 }
 0x24e   :  { %v3564_v28 = vpop.eup %3563 }
 0x24f   :  { %v3566_v29 = vpop.eup %3565  ;;  %v822_v30 = vcombine.low %v3560_v25, %v3564_v28  ;;  %v3353_v25 = vld [vmem:[#allocation10 + $0x428] ss:$28 sps:$4 sm:$0xff]  }
 0x250   :  { %v823_v31 = vcombine.low %v3562_v26, %v3566_v29  ;;  %v3356_v26 = vld [vmem:[#allocation10 + $0x430] ss:$28 sps:$4 sm:$0xff]   ;;  %v3359_v29 = vld [vmem:[#allocation10 + $0x460] ss:$28 sps:$4 sm:$0xff]  }
 0x251   :  { %v830_v32 = vrot.slane %v822_v30, %v829_v27  ;;  %v3364_v28 = vld [vmem:[#allocation10 + $0x46c] ss:$28 sps:$4 sm:$0xff]  }
 0x252   :  { %v837_v33 = vrot.slane %v823_v31, %v829_v27  ;;  %v3362_v30 = vld [vmem:[#allocation10 + $0x468] ss:$28 sps:$4 sm:$0xff]   ;;  %v3367_v31 = vld [vmem:[#allocation10 + $0x49c] ss:$28 sps:$4 sm:$0xff]  }
 0x254   :  { %v838_v34 = vcombine.low %v830_v32, %v837_v33  ;;  %v3370_v32 = vld [vmem:[#allocation10 + $0x4a4] ss:$28 sps:$4 sm:$0xff]   ;;  %v3365_v33 = vld [vmem:[#allocation10 + $0x498] ss:$28 sps:$4 sm:$0xff]  }
 0x256   :  { %v845_v36 = vrot.slane %v838_v34, %v829_v27  ;;  %v3368_v34 = vld [vmem:[#allocation10 + $0x4a0] ss:$28 sps:$4 sm:$0xff]  }
 0x258   :  { %v847_v37 = vmul.f32 %v845_v36, %v809_v35  ;;  %v3373_v35 = vld [vmem:[#allocation10 + $0x4d4] ss:$28 sps:$4 sm:$0xff]   ;;  %v3376_v36 = vld [vmem:[#allocation10 + $0x4dc] ss:$28 sps:$4 sm:$0xff]  }
 0x25a   :  { %v861_v38 = vrot.slane %v847_v37, %v3856_v43  ;;  %v865_v39 = vrot.slane %v847_v37, %v3862_v45  ;;  %v853_v40 = vrot.slane %v847_v37, %v3848_v21  ;;  %v857_v41 = vrot.slane %v847_v37, %v3851_v23  ;;  %v3371_v37 = vld [vmem:[#allocation10 + $0x4d0] ss:$28 sps:$4 sm:$0xff]  }
 0x25c   :  { %v872_v42 = vmul.f32 %v861_v38, %v763_v55  ;;  %v873_v44 = vmul.f32 %v865_v39, %v764_v61  ;;  %v907_v46 = vmul.f32 %v865_v39, %v3874_v57  ;;  %v870_v47 = vmul.f32 %v853_v40, %v761_v51  ;;  %v848_v55 = vld [vmem:[%s3966_s6] sm:$0xf] }
 0x25d   :  { %v871_v48 = vmul.f32 %v857_v41, %v762_v59  ;;  %v905_v49 = vmul.f32 %v857_v41, %v3872_v56  ;;  %v904_v50 = vmul.f32 %v853_v40, %v3868_v52  ;;  %v906_v54 = vmul.f32 %v861_v38, %v3870_v53  ;;  %v3374_v38 = vld [vmem:[#allocation10 + $0x4d8] ss:$28 sps:$4 sm:$0xff]   ;;  %v3379_v39 = vld [vmem:[#allocation10 + $0x50c] ss:$28 sps:$4 sm:$0xff]  }
 0x25e   :  { %v879_v58 = vcombine.low %v872_v42, %v873_v44  ;;  %v3382_v40 = vld [vmem:[#allocation10 + $0x514] ss:$28 sps:$4 sm:$0xff]   ;;  %v3377_v41 = vld [vmem:[#allocation10 + $0x508] ss:$28 sps:$4 sm:$0xff]  }
 0x25f   :  { %v878_v60 = vcombine.low %v870_v47, %v871_v48  ;;  %v3380_v42 = vld [vmem:[#allocation10 + $0x510] ss:$28 sps:$4 sm:$0xff]   ;;  %v3385_v44 = vld [vmem:[#allocation10 + $0x544] ss:$28 sps:$4 sm:$0xff]  }
 0x260   :  { %v893_v62 = vrot.slane %v879_v58, %v829_v27  ;;  %v3383_v47 = vld [vmem:[#allocation10 + $0x540] ss:$28 sps:$4 sm:$0xff]   ;;  %v3386_v48 = vld [vmem:[#allocation10 + $0x548] ss:$28 sps:$4 sm:$0xff]  }
 0x261   :  { %v886_v63 = vrot.slane %v878_v60, %v829_v27  ;;  %v3392_v58 = vld [vmem:[#allocation10 + $0x580] ss:$28 sps:$4 sm:$0xff]   ;;  %v3397_v60 = vld [vmem:[#allocation10 + $0x5b4] ss:$28 sps:$4 sm:$0xff]  }
 0x263   :  { %v894_v0 = vcombine.low %v886_v63, %v893_v62  ;;  %v3400_v62 = vld [vmem:[#allocation10 + $0x5bc] ss:$28 sps:$4 sm:$0xff]   ;;  %v3395_v63 = vld [vmem:[#allocation10 + $0x5b0] ss:$28 sps:$4 sm:$0xff]  }
 0x265   :  { %v901_v61 = vrot.slane %v894_v0, %v829_v27  ;;  %v3361_v27 = vld [vmem:[#allocation10 + $0x464] ss:$28 sps:$4 sm:$0xff]   ;;  %v3398_v0 = vld [vmem:[#allocation10 + $0x5b8] ss:$28 sps:$4 sm:$0xff]  }
 0x267   :  { %v903_v1 = vsub.f32 %v848_v55, %v901_v61  ;;  %v3403_v55 = vld [vmem:[#allocation10 + $0x5ec] ss:$28 sps:$4 sm:$0xff]   ;;  %v3406_v61 = vld [vmem:[#allocation10 + $0x5f4] ss:$28 sps:$4 sm:$0xff]  }
 0x269   :  { %v916_v57 = vrot.slane %v903_v1, %v3851_v23  ;;  %v912_v51 = vrot.slane %v903_v1, %v3848_v21  ;;  %v924_v56 = vrot.slane %v903_v1, %v3862_v45  ;;  %v920_v52 = vrot.slane %v903_v1, %v3856_v43  ;;  %v3401_v1 = vld [vmem:[#allocation10 + $0x5e8] ss:$28 sps:$4 sm:$0xff]  }
 0x26b   :  { %v930_v53 = vadd.f32 %v916_v57, %v905_v49  ;;  %v929_v59 = vadd.f32 %v912_v51, %v904_v50  ;;  %v932_v2 = vadd.f32 %v924_v56, %v907_v46  ;;  %v3911_v3 = vadd.f32 %v920_v52, %v906_v54  ;;  %v3388_v46 = vld [vmem:[#allocation10 + $0x54c] ss:$28 sps:$4 sm:$0xff]   ;;  %v3391_v49 = vld [vmem:[#allocation10 + $0x57c] ss:$28 sps:$4 sm:$0xff]   ;;  %v3394_v50 = vld [vmem:[#allocation10 + $0x584] ss:$28 sps:$4 sm:$0xff]  }
 0x26c   :  { %v3389_v54 = vld [vmem:[#allocation10 + $0x578] ss:$28 sps:$4 sm:$0xff]   ;;  %v3404_v57 = vld [vmem:[#allocation10 + $0x5f0] ss:$28 sps:$4 sm:$0xff]   ;;  %v3409_v51 = vld [vmem:[#allocation10 + $0x624] ss:$28 sps:$4 sm:$0xff]  }
 0x26d   :  { %v934_v4 = vmax.f32 %v930_v53, 0.0  ;;  %v933_v5 = vmax.f32 %v929_v59, 0.0  ;;  %v936_v6 = vmax.f32 %v932_v2, 0.0  ;;  %v3412_v56 = vld [vmem:[#allocation10 + $0x62c] ss:$28 sps:$4 sm:$0xff]  }
 0x26e   :  { %v3407_v52 = vld [vmem:[#allocation10 + $0x620] ss:$28 sps:$4 sm:$0xff]   ;;  %v3410_v53 = vld [vmem:[#allocation10 + $0x628] ss:$28 sps:$4 sm:$0xff]  }
 0x26f   :  { %v3913_v7 = vpack.c.bf16 %v934_v4, %v934_v4  ;;  %v3915_v10 = vpack.c.bf16 %v933_v5, %v933_v5  ;;  %v3921_v13 = vpack.c.bf16 %v936_v6, %v936_v6  ;;  %v3415_v59 = vld [vmem:[#allocation10 + $0x65c] ss:$28 sps:$4 sm:$0xff]   ;;  %v3418_v2 = vld [vmem:[#allocation10 + $0x664] ss:$28 sps:$4 sm:$0xff]   ;;  %v3421_v6 = vld [vmem:[#allocation10 + $0x694] ss:$28 sps:$4 sm:$0xff]  }
 0x270   :  { %v3413_v4 = vld [vmem:[#allocation10 + $0x658] ss:$28 sps:$4 sm:$0xff]   ;;  %v3416_v5 = vld [vmem:[#allocation10 + $0x660] ss:$28 sps:$4 sm:$0xff]  }
 0x271   :  { %2418 = vmatprep.mubr.bf16.mxu1 %v3913_v7  ;;  %2500 = vmatprep.mubr.bf16.mxu0 %v3913_v7 }
 0x272   :  { %2419 = vmatmul.mubr.bf16.vlgmr.msra.gmra.mrb[4].mxu1 %v3915_v10  ;;  %2501 = vmatmul.mubr.bf16.vlgmr.msra.gmra.mrb[8].mxu0 %v3915_v10 }
 0x273   :  { %2428 = vmatpush1.bf16.msra.mxu1 %v3335_v8  ;;  %2510 = vmatpush1.bf16.msra.mxu0 %v3338_v9  ;;  %v3424_v8 = vld [vmem:[#allocation10 + $0x69c] ss:$28 sps:$4 sm:$0xff]   ;;  %v3419_v9 = vld [vmem:[#allocation10 + $0x690] ss:$28 sps:$4 sm:$0xff]  }
 0x274   :  { %2459 = vmatprep.mubr.bf16.mxu1 %v3921_v13  ;;  %2541 = vmatprep.mubr.bf16.mxu0 %v3921_v13 }
 0x275   :  { %2429 = vmatprep.subr.bf16.mxu1 %v3343_v11  ;;  %2511 = vmatprep.subr.bf16.mxu0 %v3346_v12  ;;  %v3422_v11 = vld [vmem:[#allocation10 + $0x698] ss:$28 sps:$4 sm:$0xff]   ;;  %v3427_v12 = vld [vmem:[#allocation10 + $0x6cc] ss:$28 sps:$4 sm:$0xff]  }
 0x277   :  { %2430 = vmatpush1.bf16.msra.mxu1 %v3341_v14  ;;  %2512 = vmatpush1.bf16.msra.mxu0 %v3344_v15  ;;  %v3430_v14 = vld [vmem:[#allocation10 + $0x6d4] ss:$28 sps:$4 sm:$0xff]   ;;  %v3425_v15 = vld [vmem:[#allocation10 + $0x6c8] ss:$28 sps:$4 sm:$0xff]  }
 0x278   :  { %2431 = vmatprep.subr.bf16.mxu1 %v3349_v16  ;;  %2513 = vmatprep.subr.bf16.mxu0 %v3352_v17  ;;  %v3428_v16 = vld [vmem:[#allocation10 + $0x6d0] ss:$28 sps:$4 sm:$0xff]   ;;  %v935_v17 = vmax.f32 %v3911_v3, 0.0  ;;  %v3436_v3 = vld [vmem:[#allocation10 + $0x48] ss:$28 sps:$4 sm:$0xff]  }
 0x27b   :  { %2432 = vmatpush1.bf16.msra.mxu1 %v3347_v18  ;;  %2514 = vmatpush1.bf16.msra.mxu0 %v3350_v19  ;;  %v3433_v18 = vld [vmem:[#allocation10 + $0x14] ss:$28 sps:$4 sm:$0xff]  }
 0x27c   :  { %2433 = vmatprep.subr.bf16.mxu1 %v3355_v22  ;;  %2515 = vmatprep.subr.bf16.mxu0 %v3358_v24  ;;  %v3434_v19 = vld [vmem:[#allocation10 + $0x1d8] ss:$28 sps:$4 sm:$0xff]   ;;  %v3431_v22 = vld [vmem:[#allocation10 + $0x10] ss:$28 sps:$4 sm:$0xff]   ;;  %v3926_v24 = vpack.c.bf16 %v935_v17, %v935_v17 }
 0x27d   :  { %v3500_v17 = vld [vmem:[#allocation10 + $0x4b0] ss:$28 sps:$4 sm:$0xff]  }
 0x27f   :  { %2434 = vmatpush1.bf16.msra.mxu1 %v3353_v25  ;;  %2516 = vmatpush1.bf16.msra.mxu0 %v3356_v26  ;;  %v3435_v25 = vld [vmem:[#allocation10 + $0x18] ss:$28 sps:$4 sm:$0xff]   ;;  %v3438_v26 = vld [vmem:[#allocation10 + $0x4c] ss:$28 sps:$4 sm:$0xff]  }
 0x280   :  { %2435 = vmatprep.subr.bf16.mxu1 %v3361_v27  ;;  %2517 = vmatprep.subr.bf16.mxu0 %v3364_v28  ;;  %v3439_v27 = vld [vmem:[#allocation10 + $0x210] ss:$28 sps:$4 sm:$0xff]  }
 0x281   :  { %v3440_v28 = vld [vmem:[#allocation10 + $0x50] ss:$28 sps:$4 sm:$0xff]  }
 0x283   :  { %2436 = vmatpush1.bf16.msra.mxu1 %v3359_v29  ;;  %2518 = vmatpush1.bf16.msra.mxu0 %v3362_v30  ;;  %v3443_v29 = vld [vmem:[#allocation10 + $0x84] ss:$28 sps:$4 sm:$0xff]  }
 0x284   :  { %2437 = vmatprep.subr.bf16.mxu1 %v3367_v31  ;;  %2519 = vmatprep.subr.bf16.mxu0 %v3370_v32  ;;  %v3444_v30 = vld [vmem:[#allocation10 + $0x248] ss:$28 sps:$4 sm:$0xff]   ;;  %v3441_v31 = vld [vmem:[#allocation10 + $0x80] ss:$28 sps:$4 sm:$0xff]  }
 0x285   :  { %v3445_v32 = vld [vmem:[#allocation10 + $0x88] ss:$28 sps:$4 sm:$0xff]  }
 0x287   :  { %2438 = vmatpush1.bf16.msra.mxu1 %v3365_v33  ;;  %2520 = vmatpush1.bf16.msra.mxu0 %v3368_v34  ;;  %v3448_v33 = vld [vmem:[#allocation10 + $0xbc] ss:$28 sps:$4 sm:$0xff]  }
 0x288   :  { %2439 = vmatprep.subr.bf16.mxu1 %v3373_v35  ;;  %2521 = vmatprep.subr.bf16.mxu0 %v3376_v36  ;;  %v3449_v34 = vld [vmem:[#allocation10 + $0x280] ss:$28 sps:$4 sm:$0xff]   ;;  %v3446_v35 = vld [vmem:[#allocation10 + $0xb8] ss:$28 sps:$4 sm:$0xff]  }
 0x289   :  { %v3450_v36 = vld [vmem:[#allocation10 + $0xc0] ss:$28 sps:$4 sm:$0xff]  }
 0x28b   :  { %2440 = vmatpush1.bf16.msra.mxu1 %v3371_v37  ;;  %2522 = vmatpush1.bf16.msra.mxu0 %v3374_v38  ;;  %v3453_v37 = vld [vmem:[#allocation10 + $0xf4] ss:$28 sps:$4 sm:$0xff]  }
 0x28c   :  { %2441 = vmatprep.subr.bf16.mxu1 %v3379_v39  ;;  %2523 = vmatprep.subr.bf16.mxu0 %v3382_v40  ;;  %v3451_v38 = vld [vmem:[#allocation10 + $0xf0] ss:$28 sps:$4 sm:$0xff]   ;;  %v3455_v39 = vld [vmem:[#allocation10 + $0xf8] ss:$28 sps:$4 sm:$0xff]  }
 0x28d   :  { %v3458_v40 = vld [vmem:[#allocation10 + $0x12c] ss:$28 sps:$4 sm:$0xff]  }
 0x28f   :  { %2442 = vmatpush1.bf16.msra.mxu1 %v3377_v41  ;;  %2524 = vmatpush1.bf16.msra.mxu0 %v3380_v42  ;;  %v3459_v41 = vld [vmem:[#allocation10 + $0x2f0] ss:$28 sps:$4 sm:$0xff]   ;;  %v3456_v42 = vld [vmem:[#allocation10 + $0x128] ss:$28 sps:$4 sm:$0xff]  }
 0x290   :  { %2443 = vmatprep.subr.bf16.mxu1 %v3385_v44  ;;  %2525 = vmatprep.subr.bf16.mxu0 %v3388_v46  ;;  %v3460_v44 = vld [vmem:[#allocation10 + $0x130] ss:$28 sps:$4 sm:$0xff]   ;;  %v3463_v46 = vld [vmem:[#allocation10 + $0x164] ss:$28 sps:$4 sm:$0xff]  }
 0x293   :  { %2444 = vmatpush1.bf16.msra.mxu1 %v3383_v47  ;;  %2526 = vmatpush1.bf16.msra.mxu0 %v3386_v48  ;;  %v3464_v47 = vld [vmem:[#allocation10 + $0x328] ss:$28 sps:$4 sm:$0xff]   ;;  %v3461_v48 = vld [vmem:[#allocation10 + $0x160] ss:$28 sps:$4 sm:$0xff]  }
 0x294   :  { %2445 = vmatprep.subr.bf16.mxu1 %v3391_v49  ;;  %2527 = vmatprep.subr.bf16.mxu0 %v3394_v50  ;;  %v3465_v49 = vld [vmem:[#allocation10 + $0x168] ss:$28 sps:$4 sm:$0xff]   ;;  %v3468_v50 = vld [vmem:[#allocation10 + $0x19c] ss:$28 sps:$4 sm:$0xff]  }
 0x297   :  { %2446 = vmatpush1.bf16.msra.mxu1 %v3389_v54  ;;  %2528 = vmatpush1.bf16.msra.mxu0 %v3392_v58  ;;  %v3469_v54 = vld [vmem:[#allocation10 + $0x360] ss:$28 sps:$4 sm:$0xff]   ;;  %v3466_v58 = vld [vmem:[#allocation10 + $0x198] ss:$28 sps:$4 sm:$0xff]  }
 0x298   :  { %2447 = vmatprep.subr.bf16.mxu1 %v3397_v60  ;;  %2529 = vmatprep.subr.bf16.mxu0 %v3400_v62  ;;  %v3470_v60 = vld [vmem:[#allocation10 + $0x1a0] ss:$28 sps:$4 sm:$0xff]   ;;  %v3473_v62 = vld [vmem:[#allocation10 + $0x1d4] ss:$28 sps:$4 sm:$0xff]  }
 0x29b   :  { %2448 = vmatpush1.bf16.msra.mxu1 %v3395_v63  ;;  %2530 = vmatpush1.bf16.msra.mxu0 %v3398_v0  ;;  %v3474_v63 = vld [vmem:[#allocation10 + $0x558] ss:$28 sps:$4 sm:$0xff]   ;;  %v3471_v0 = vld [vmem:[#allocation10 + $0x1d0] ss:$28 sps:$4 sm:$0xff]  }
 0x29c   :  { %2449 = vmatprep.subr.bf16.mxu1 %v3403_v55  ;;  %2531 = vmatprep.subr.bf16.mxu0 %v3406_v61  ;;  %v3475_v55 = vld [vmem:[#allocation10 + $0x398] ss:$28 sps:$4 sm:$0xff]   ;;  %v3478_v61 = vld [vmem:[#allocation10 + $0x20c] ss:$28 sps:$4 sm:$0xff]  }
 0x29f   :  { %2450 = vmatpush1.bf16.msra.mxu1 %v3401_v1  ;;  %2532 = vmatpush1.bf16.msra.mxu0 %v3404_v57  ;;  %v3479_v1 = vld [vmem:[#allocation10 + $0x590] ss:$28 sps:$4 sm:$0xff]   ;;  %v3476_v57 = vld [vmem:[#allocation10 + $0x208] ss:$28 sps:$4 sm:$0xff]  }
 0x2a0   :  { %2451 = vmatprep.subr.bf16.mxu1 %v3409_v51  ;;  %2533 = vmatprep.subr.bf16.mxu0 %v3412_v56  ;;  %v3480_v51 = vld [vmem:[#allocation10 + $0x3d0] ss:$28 sps:$4 sm:$0xff]   ;;  %v3483_v56 = vld [vmem:[#allocation10 + $0x244] ss:$28 sps:$4 sm:$0xff]  }
 0x2a3   :  { %2452 = vmatpush1.bf16.msra.mxu1 %v3407_v52  ;;  %2534 = vmatpush1.bf16.msra.mxu0 %v3410_v53  ;;  %v3484_v52 = vld [vmem:[#allocation10 + $0x5c8] ss:$28 sps:$4 sm:$0xff]   ;;  %v3481_v53 = vld [vmem:[#allocation10 + $0x240] ss:$28 sps:$4 sm:$0xff]  }
 0x2a4   :  { %2453 = vmatprep.subr.bf16.mxu1 %v3415_v59  ;;  %2535 = vmatprep.subr.bf16.mxu0 %v3418_v2  ;;  %v3485_v59 = vld [vmem:[#allocation10 + $0x408] ss:$28 sps:$4 sm:$0xff]   ;;  %v3488_v2 = vld [vmem:[#allocation10 + $0x27c] ss:$28 sps:$4 sm:$0xff]  }
 0x2a7   :  { %2454 = vmatpush1.bf16.msra.mxu1 %v3413_v4  ;;  %2536 = vmatpush1.bf16.msra.mxu0 %v3416_v5  ;;  %v3489_v4 = vld [vmem:[#allocation10 + $0x600] ss:$28 sps:$4 sm:$0xff]   ;;  %v3486_v5 = vld [vmem:[#allocation10 + $0x278] ss:$28 sps:$4 sm:$0xff]  }
 0x2a8   :  { %2455 = vmatprep.subr.bf16.mxu1 %v3421_v6  ;;  %2537 = vmatprep.subr.bf16.mxu0 %v3424_v8  ;;  %v3490_v6 = vld [vmem:[#allocation10 + $0x440] ss:$28 sps:$4 sm:$0xff]   ;;  %v3493_v8 = vld [vmem:[#allocation10 + $0x2b4] ss:$28 sps:$4 sm:$0xff]  }
 0x2ab   :  { %2456 = vmatpush1.bf16.msra.mxu1 %v3419_v9  ;;  %2538 = vmatpush1.bf16.msra.mxu0 %v3422_v11  ;;  %v3494_v9 = vld [vmem:[#allocation10 + $0x638] ss:$28 sps:$4 sm:$0xff]   ;;  %v3491_v11 = vld [vmem:[#allocation10 + $0x2b0] ss:$28 sps:$4 sm:$0xff]  }
 0x2ac   :  { %2457 = vmatprep.subr.bf16.mxu1 %v3427_v12  ;;  %2539 = vmatprep.subr.bf16.mxu0 %v3430_v14  ;;  %v3495_v12 = vld [vmem:[#allocation10 + $0x478] ss:$28 sps:$4 sm:$0xff]   ;;  %v3498_v14 = vld [vmem:[#allocation10 + $0x2ec] ss:$28 sps:$4 sm:$0xff]  }
 0x2af   :  { %2458 = vmatpush1.bf16.msra.mxu1 %v3425_v15  ;;  %2540 = vmatpush1.bf16.msra.mxu0 %v3428_v16  ;;  %v3499_v15 = vld [vmem:[#allocation10 + $0x670] ss:$28 sps:$4 sm:$0xff]   ;;  %v3496_v16 = vld [vmem:[#allocation10 + $0x2e8] ss:$28 sps:$4 sm:$0xff]  }
 0x2b0   :  { %2550 = vmatprep.subr.bf16.mxu1 %v3433_v18  ;;  %3047 = vmatprep.subr.bf16.mxu0 %v3434_v19  ;;  %v3503_v18 = vld [vmem:[#allocation10 + $0x324] ss:$28 sps:$4 sm:$0xff]  }
 0x2b1   :  { %v3504_v19 = vld [vmem:[#allocation10 + $0x6a8] ss:$28 sps:$4 sm:$0xff]  }
 0x2b2   :  { %2460 = vmatmul.mubr.bf16.vlgmr.msra.gmra.mrb[4].mxu1 %v3926_v24  ;;  %2542 = vmatmul.mubr.bf16.vlgmr.msra.gmra.mrb[8].mxu0 %v3926_v24 }
 0x2b3   :  { %2551 = vmatpush1.bf16.msra.mxu1 %v3431_v22  ;;  %2582 = vmatprep.mubr.bf16.mxu1 %v3913_v7  ;;  %v3501_v22 = vld [vmem:[#allocation10 + $0x320] ss:$28 sps:$4 sm:$0xff]  }
 0x2b4   :  { %3048 = vmatpush3.bf16.msra.mxu0 %v3435_v25  ;;  %2664 = vmatprep.mubr.bf16.mxu0 %v3913_v7  ;;  %v3454_v7 = vld [vmem:[#allocation10 + $0x2b8] ss:$28 sps:$4 sm:$0xff]   ;;  %v3505_v25 = vld [vmem:[#allocation10 + $0x4e8] ss:$28 sps:$4 sm:$0xff]  }
 0x2b5   :  { %2552 = vmatprep.subr.bf16.mxu1 %v3438_v26  ;;  %3049 = vmatprep.subr.bf16.mxu0 %v3439_v27  ;;  %v3508_v26 = vld [vmem:[#allocation10 + $0x35c] ss:$28 sps:$4 sm:$0xff]  }
 0x2b6   :  { %v3509_v27 = vld [vmem:[#allocation10 + $0x6e0] ss:$28 sps:$4 sm:$0xff]  }
 0x2b7   :  { %2553 = vmatpush1.bf16.msra.mxu1 %v3436_v3  ;;  %v3506_v3 = vld [vmem:[#allocation10 + $0x358] ss:$28 sps:$4 sm:$0xff]  }
 0x2b8   :  { %3050 = vmatpush3.bf16.msra.mxu0 %v3440_v28  ;;  %2554 = vmatprep.subr.bf16.mxu1 %v3443_v29  ;;  %v3510_v28 = vld [vmem:[#allocation10 + $0x520] ss:$28 sps:$4 sm:$0xff]   ;;  %v3513_v29 = vld [vmem:[#allocation10 + $0x394] ss:$28 sps:$4 sm:$0xff]  }
 0x2b9   :  { %3051 = vmatprep.subr.bf16.mxu0 %v3444_v30  ;;  %v3511_v30 = vld [vmem:[#allocation10 + $0x390] ss:$28 sps:$4 sm:$0xff]  }
 0x2bb   :  { %2555 = vmatpush1.bf16.msra.mxu1 %v3441_v31  ;;  %v3516_v31 = vld [vmem:[#allocation10 + $0x3cc] ss:$28 sps:$4 sm:$0xff]  }
 0x2bc   :  { %3052 = vmatpush3.bf16.msra.mxu0 %v3445_v32  ;;  %2556 = vmatprep.subr.bf16.mxu1 %v3448_v33  ;;  %v3514_v32 = vld [vmem:[#allocation10 + $0x3c8] ss:$28 sps:$4 sm:$0xff]  }
 0x2bd   :  { %3053 = vmatprep.subr.bf16.mxu0 %v3449_v34  ;;  %v3519_v33 = vld [vmem:[#allocation10 + $0x404] ss:$28 sps:$4 sm:$0xff]  }
 0x2be   :  { %v3517_v34 = vld [vmem:[#allocation10 + $0x400] ss:$28 sps:$4 sm:$0xff]  }
 0x2bf   :  { %2557 = vmatpush1.bf16.msra.mxu1 %v3446_v35  ;;  %v3522_v35 = vld [vmem:[#allocation10 + $0x43c] ss:$28 sps:$4 sm:$0xff]  }
 0x2c0   :  { %3054 = vmatpush3.bf16.msra.mxu0 %v3450_v36  ;;  %2558 = vmatprep.subr.bf16.mxu1 %v3453_v37  ;;  %v3520_v36 = vld [vmem:[#allocation10 + $0x438] ss:$28 sps:$4 sm:$0xff]  }
 0x2c1   :  { %3055 = vmatprep.subr.bf16.mxu0 %v3454_v7  ;;  %v3525_v37 = vld [vmem:[#allocation10 + $0x474] ss:$28 sps:$4 sm:$0xff]  }
 0x2c2   :  { %v3523_v7 = vld [vmem:[#allocation10 + $0x470] ss:$28 sps:$4 sm:$0xff]  }
 0x2c3   :  { %2559 = vmatpush1.bf16.msra.mxu1 %v3451_v38  ;;  %v3526_v38 = vld [vmem:[#allocation10 + $0x4a8] ss:$28 sps:$4 sm:$0xff]  }
 0x2c4   :  { %3056 = vmatpush3.bf16.msra.mxu0 %v3455_v39  ;;  %2560 = vmatprep.subr.bf16.mxu1 %v3458_v40  ;;  %v3531_v39 = vld [vmem:[#allocation10 + $0x4e4] ss:$28 sps:$4 sm:$0xff]   ;;  %v3534_v40 = vld [vmem:[#allocation10 + $0x51c] ss:$28 sps:$4 sm:$0xff]  }
 0x2c5   :  { %3057 = vmatprep.subr.bf16.mxu0 %v3459_v41  ;;  %v3532_v41 = vld [vmem:[#allocation10 + $0x518] ss:$28 sps:$4 sm:$0xff]  }
 0x2c7   :  { %2561 = vmatpush1.bf16.msra.mxu1 %v3456_v42  ;;  %v3537_v42 = vld [vmem:[#allocation10 + $0x554] ss:$28 sps:$4 sm:$0xff]  }
 0x2c8   :  { %3058 = vmatpush3.bf16.msra.mxu0 %v3460_v44  ;;  %2562 = vmatprep.subr.bf16.mxu1 %v3463_v46  ;;  %v3535_v44 = vld [vmem:[#allocation10 + $0x550] ss:$28 sps:$4 sm:$0xff]  }
 0x2c9   :  { %3059 = vmatprep.subr.bf16.mxu0 %v3464_v47  ;;  %v3540_v46 = vld [vmem:[#allocation10 + $0x58c] ss:$28 sps:$4 sm:$0xff]  }
 0x2ca   :  { %v3538_v47 = vld [vmem:[#allocation10 + $0x588] ss:$28 sps:$4 sm:$0xff]  }
 0x2cb   :  { %2563 = vmatpush1.bf16.msra.mxu1 %v3461_v48  ;;  %v3543_v48 = vld [vmem:[#allocation10 + $0x5c4] ss:$28 sps:$4 sm:$0xff]  }
 0x2cc   :  { %3060 = vmatpush3.bf16.msra.mxu0 %v3465_v49  ;;  %2564 = vmatprep.subr.bf16.mxu1 %v3468_v50  ;;  %v3541_v49 = vld [vmem:[#allocation10 + $0x5c0] ss:$28 sps:$4 sm:$0xff]  }
 0x2cd   :  { %3061 = vmatprep.subr.bf16.mxu0 %v3469_v54  ;;  %v3546_v50 = vld [vmem:[#allocation10 + $0x5fc] ss:$28 sps:$4 sm:$0xff]  }
 0x2ce   :  { %v3544_v54 = vld [vmem:[#allocation10 + $0x5f8] ss:$28 sps:$4 sm:$0xff]  }
 0x2cf   :  { %2565 = vmatpush1.bf16.msra.mxu1 %v3466_v58  ;;  %v3549_v58 = vld [vmem:[#allocation10 + $0x634] ss:$28 sps:$4 sm:$0xff]  }
 0x2d0   :  { %3062 = vmatpush3.bf16.msra.mxu0 %v3470_v60  ;;  %2566 = vmatprep.subr.bf16.mxu1 %v3473_v62  ;;  %v3547_v60 = vld [vmem:[#allocation10 + $0x630] ss:$28 sps:$4 sm:$0xff]  }
 0x2d1   :  { %3069 = vmatprep.subr.bf16.mxu0 %v3474_v63  ;;  %v3552_v62 = vld [vmem:[#allocation10 + $0x66c] ss:$28 sps:$4 sm:$0xff]  }
 0x2d2   :  { %v3550_v63 = vld [vmem:[#allocation10 + $0x668] ss:$28 sps:$4 sm:$0xff]  }
 0x2d3   :  { %2665 = vmatmul.mubr.bf16.vlgmr.msra.gmra.mrb[12].mxu0 %v3915_v10  ;;  %2567 = vmatpush1.bf16.msra.mxu1 %v3471_v0  ;;  %v3555_v0 = vld [vmem:[#allocation10 + $0x6a4] ss:$28 sps:$4 sm:$0xff]  }
 0x2d4   :  { %3070 = vmatpush3.bf16.msra.mxu0 %v3475_v55  ;;  %2704 = vmatprep.mubr.bf16.mxu0 %v3921_v13  ;;  %v3553_v55 = vld [vmem:[#allocation10 + $0x6a0] ss:$28 sps:$4 sm:$0xff]  }
 0x2d5   :  { %2568 = vmatprep.subr.bf16.mxu1 %v3478_v61  ;;  %3071 = vmatprep.subr.bf16.mxu0 %v3479_v1  ;;  %v3558_v61 = vld [vmem:[#allocation10 + $0x6dc] ss:$28 sps:$4 sm:$0xff]  }
 0x2d6   :  { %v3556_v1 = vld [vmem:[#allocation10 + $0x6d8] ss:$28 sps:$4 sm:$0xff]  }
 0x2d7   :  { %2569 = vmatpush1.bf16.msra.mxu1 %v3476_v57  ;;  %v1197_v57 = vld [vmem:[%s3968_s8] sm:$0xff]  ;;  %s3734_s8 = smov [#allocation11]  }
 0x2d8   :  { %3072 = vmatpush3.bf16.msra.mxu0 %v3480_v51  ;;  %2570 = vmatprep.subr.bf16.mxu1 %v3483_v56  ;;  %v1202_v51 = vrot.slane %v1197_v57, %v3848_v21  ;;  %v1210_v56 = vrot.slane %v1197_v57, %v3856_v43  ;;  %s2732_s11 = sshll.u32 %s3734_s8, 4  ;;  %s2733_s11 = int_to_ptr.vmem [resolvable:$true] %s2732_s11 }
 0x2d9   :  { %3073 = vmatprep.subr.bf16.mxu0 %v3484_v52  ;;  %v1206_v52 = vrot.slane %v1197_v57, %v3851_v23  ;;  %s3691_s12 = scalar_lea.vmem %s2733_s11, 896  ;;  %p3696_p13 = scmp.lt.s32.totalorder %s2733_s11, %s2733_s11 }
 0x2da   :  { %p3692_p12 = scmp.ne.s32.totalorder %s2733_s11, %s3691_s12  ;;  %p3697_p0 = scmp.lt.s32.totalorder %s3691_s12, %s3691_s12 }
 0x2db   :  { %2571 = vmatpush1.bf16.msra.mxu1 %v3481_v53  ;;  %v1214_v53 = vrot.slane %v1197_v57, %v3862_v45 }
 0x2dc   :  { %3074 = vmatpush3.bf16.msra.mxu0 %v3485_v59  ;;  %2572 = vmatprep.subr.bf16.mxu1 %v3488_v2  ;;  %p3698_p1 = por %p3697_p0, %p3696_p13 }
 0x2dd   :  { %3075 = vmatprep.subr.bf16.mxu0 %v3489_v4 }
 0x2de   :  { %p3699_p2 = pnand %p3698_p1, %p3692_p12 }
 0x2df   :  { %2573 = vmatpush1.bf16.msra.mxu1 %v3486_v5 }
 0x2e0   :  { %3076 = vmatpush3.bf16.msra.mxu0 %v3490_v6  ;;  %2574 = vmatprep.subr.bf16.mxu1 %v3493_v8 }
 0x2e1   :  { %3077 = vmatprep.subr.bf16.mxu0 %v3494_v9 }
 0x2e3   :  { %2575 = vmatpush1.bf16.msra.mxu1 %v3491_v11 }
 0x2e4   :  { %3078 = vmatpush3.bf16.msra.mxu0 %v3495_v12  ;;  %2576 = vmatprep.subr.bf16.mxu1 %v3498_v14 }
 0x2e5   :  { %3079 = vmatprep.subr.bf16.mxu0 %v3499_v15 }
 0x2e7   :  { %2577 = vmatpush1.bf16.msra.mxu1 %v3496_v16 }
 0x2e8   :  { %3080 = vmatpush3.bf16.msra.mxu0 %v3500_v17  ;;  %2578 = vmatprep.subr.bf16.mxu1 %v3503_v18 }
 0x2e9   :  { %3081 = vmatprep.subr.bf16.mxu0 %v3504_v19 }
 0x2eb   :  { %2579 = vmatpush1.bf16.msra.mxu1 %v3501_v22 }
 0x2ec   :  { %3082 = vmatpush3.bf16.msra.mxu0 %v3505_v25  ;;  %2580 = vmatprep.subr.bf16.mxu1 %v3508_v26  ;;  %v1225_v25 = vsub.s32 6, %v3845_v20 }
 0x2ed   :  { %3083 = vmatprep.subr.bf16.mxu0 %v3509_v27 }
 0x2ee   :  { %v1226_v26 = vrot.slane %v1197_v57, %v1225_v25 }
 0x2ef   :  { %2581 = vmatpush1.bf16.msra.mxu1 %v3506_v3 }
 0x2f0   :  { %3084 = vmatpush3.bf16.msra.mxu0 %v3510_v28  ;;  %2591 = vmatprep.subr.bf16.mxu1 %v3513_v29 }
 0x2f2   :  { %2583 = vmatmul.mubr.bf16.vlgmr.msra.gmra.mrb[8].mxu1 %v3915_v10  ;;  %v3528_v10 = vld [vmem:[#allocation10 + $0x4ac] ss:$28 sps:$4 sm:$0xff]  }
 0x2f3   :  { %2705 = vmatmul.mubr.bf16.vlgmr.msra.gmra.mrb[16].mxu0 %v3926_v24  ;;  %2592 = vmatpush1.bf16.msra.mxu1 %v3511_v30 }
 0x2f4   :  { %2623 = vmatprep.mubr.bf16.mxu1 %v3921_v13  ;;  %2593 = vmatprep.subr.bf16.mxu1 %v3516_v31  ;;  %v3529_v13 = vld [vmem:[#allocation10 + $0x4e0] ss:$28 sps:$4 sm:$0xff]  }
 0x2f7   :  { %2594 = vmatpush1.bf16.msra.mxu1 %v3514_v32 }
 0x2f8   :  { %2595 = vmatprep.subr.bf16.mxu1 %v3519_v33 }
 0x2fb   :  { %2596 = vmatpush1.bf16.msra.mxu1 %v3517_v34  ;;  %v1217_v34 = vsub.s32 4, %v3845_v20 }
 0x2fc   :  { %2597 = vmatprep.subr.bf16.mxu1 %v3522_v35  ;;  %v1221_v35 = vsub.s32 5, %v3845_v20 }
 0x2ff   :  { %2598 = vmatpush1.bf16.msra.mxu1 %v3520_v36  ;;  %v1218_v36 = vrot.slane %v1197_v57, %v1217_v34 }
 0x300   :  { %2599 = vmatprep.subr.bf16.mxu1 %v3525_v37  ;;  %v1222_v37 = vrot.slane %v1197_v57, %v1221_v35 }
 0x303   :  { %2600 = vmatpush1.bf16.msra.mxu1 %v3523_v7 }
 0x304   :  { %2601 = vmatprep.subr.bf16.mxu1 %v3528_v10 }
 0x307   :  { %2602 = vmatpush1.bf16.msra.mxu1 %v3526_v38 }
 0x308   :  { %2603 = vmatprep.subr.bf16.mxu1 %v3531_v39 }
 0x30b   :  { %2604 = vmatpush1.bf16.msra.mxu1 %v3529_v13 }
 0x30c   :  { %2605 = vmatprep.subr.bf16.mxu1 %v3534_v40 }
 0x30f   :  { %2606 = vmatpush1.bf16.msra.mxu1 %v3532_v41 }
 0x310   :  { %2607 = vmatprep.subr.bf16.mxu1 %v3537_v42 }
 0x313   :  { %2608 = vmatpush1.bf16.msra.mxu1 %v3535_v44 }
 0x314   :  { %2609 = vmatprep.subr.bf16.mxu1 %v3540_v46 }
 0x317   :  { %2610 = vmatpush1.bf16.msra.mxu1 %v3538_v47 }
 0x318   :  { %2611 = vmatprep.subr.bf16.mxu1 %v3543_v48 }
 0x31b   :  { %2612 = vmatpush1.bf16.msra.mxu1 %v3541_v49 }
 0x31c   :  { %2613 = vmatprep.subr.bf16.mxu1 %v3546_v50 }
 0x31f   :  { %2614 = vmatpush1.bf16.msra.mxu1 %v3544_v54 }
 0x320   :  { %2615 = vmatprep.subr.bf16.mxu1 %v3549_v58 }
 0x323   :  { %2616 = vmatpush1.bf16.msra.mxu1 %v3547_v60 }
 0x324   :  { %2617 = vmatprep.subr.bf16.mxu1 %v3552_v62 }
 0x327   :  { %2618 = vmatpush1.bf16.msra.mxu1 %v3550_v63 }
 0x328   :  { %2619 = vmatprep.subr.bf16.mxu1 %v3555_v0 }
 0x32b   :  { %2620 = vmatpush1.bf16.msra.mxu1 %v3553_v55 }
 0x32c   :  { %2621 = vmatprep.subr.bf16.mxu1 %v3558_v61 }
 0x32f   :  { %2622 = vmatpush1.bf16.msra.mxu1 %v3556_v1 }
 0x332   :  { %2624 = vmatmul.mubr.bf16.vlgmr.msra.gmra.mrb[8].mxu1 %v3926_v24 }
 0x385   :  { %v2461_v59 = vpop.f32.mrb[4].mxu1  ;;  %v2543_v2 = vpop.f32.mrb[8].mxu0 }
 0x386   :  { %v3091_v4 = vadd.f32 %v2461_v59, %v1202_v51  ;;  %v3093_v5 = vadd.f32 %v2543_v2, %v1210_v56  ;;  %v2463_v6 = vpop.f32.mrb[5].mxu1  ;;  %v2545_v8 = vpop.f32.mrb[9].mxu0 }
 0x387   :  { %v3092_v9 = vadd.f32 %v2463_v6, %v1206_v52  ;;  %v3094_v24 = vadd.f32 %v2545_v8, %v1214_v53  ;;  %v2465_v11 = vpop.f32.mrb[6].mxu1  ;;  %v2547_v12 = vpop.f32.mrb[10].mxu0 }
 0x388   :  { %3567 = vtanh.f32 %v3091_v4  ;;  %v2466_v14 = vpop.f32.mrb[7].mxu1  ;;  %v2548_v15 = vpop.f32.mrb[11].mxu0 }
 0x389   :  { %3569 = vtanh.f32 %v3093_v5 }
 0x38a   :  { %3571 = vtanh.f32 %v3092_v9 }
 0x38b   :  { %3573 = vtanh.f32 %v3094_v24 }
 0x392   :  { %v3568_v21 = vpop.eup %3567 }
 0x393   :  { %v3570_v23 = vpop.eup %3569  ;;  %2719 = vst [vmem:[#allocation11] sm:$0xff] %v3568_v21 }
 0x394   :  { %v3572_v43 = vpop.eup %3571  ;;  %2721 = vst [vmem:[#allocation11 + $0x10] sm:$0xff] %v3570_v23 }
 0x395   :  { %v3574_v45 = vpop.eup %3573  ;;  %2720 = vst [vmem:[#allocation11 + $0x8] sm:$0xff] %v3572_v43 }
 0x396   :  { %2722 = vst [vmem:[#allocation11 + $0x18] sm:$0xff] %v3574_v45 }
 0x3a6   :  { %v3063_v16 = vpop.f32.mrb[12].mxu0 }
 0x3a7   :  { %v3064_v17 = vpop.f32.mrb[13].mxu0 }
 0x3a8   :  { %v3065_v18 = vadd.f32 %v3064_v17, %v3063_v16  ;;  %v3066_v19 = vpop.f32.mrb[14].mxu0 }
 0x3a9   :  { %v3067_v22 = vpop.f32.mrb[15].mxu0 }
 0x3aa   :  { %v2667_v28 = vadd.f32 %v3065_v18, %v1226_v26 }
 0x3c6   :  { %v3085_v27 = vpop.f32.mrb[16].mxu0 }
 0x3c7   :  { %v3086_v3 = vpop.f32.mrb[17].mxu0 }
 0x3c8   :  { %v3087_v29 = vadd.f32 %v3086_v3, %v3085_v27  ;;  %v3088_v30 = vpop.f32.mrb[18].mxu0 }
 0x3c9   :  { %v3089_v31 = vpop.f32.mrb[19].mxu0 }
 0x3ca   :  { %v2707_v32 = vadd.f32 %v3087_v29, %v2667_v28 }
 0x3cc   :  { %3575 = vtanh.f32 %v2707_v32 }
 0x3d6   :  { %v3576_v33 = vpop.eup %3575 }
 0x3d7   :  { %2725 = vst [vmem:[#allocation11 + $0x30] sm:$0xff] %v3576_v33 }
 0x405   :  { %v2625_v7 = vpop.f32.mrb[8].mxu1 }
 0x406   :  { %v3095_v10 = vadd.f32 %v2625_v7, %v1218_v36  ;;  %v2627_v38 = vpop.f32.mrb[9].mxu1 }
 0x407   :  { %v3096_v39 = vadd.f32 %v2627_v38, %v1222_v37  ;;  %v2629_v13 = vpop.f32.mrb[10].mxu1 }
 0x408   :  { %3577 = vtanh.f32 %v3095_v10  ;;  %v2630_v40 = vpop.f32.mrb[11].mxu1 }
 0x409   :  { %3579 = vtanh.f32 %v3096_v39 }
 0x412   :  { %v3578_v41 = vpop.eup %3577 }
 0x413   :  { %v3580_v42 = vpop.eup %3579  ;;  %2723 = vst [vmem:[#allocation11 + $0x20] sm:$0xff] %v3578_v41 }
 0x414   :  { %2724 = vst [vmem:[#allocation11 + $0x28] sm:$0xff] %v3580_v42 }
 0x415   :  { %3702 = shalt.err (!%p3699_p2)
}
 0x416   :  { %s3703_s13 = scalar_lea.hbm %s3969_s9, 896 }
 0x417   :  { %p3704_p3 = scmp.ne.s32.totalorder %s3969_s9, %s3703_s13  ;;  %p3707_p4 = scmp.lt.u32.totalorder %s3703_s13, %s3969_s9 }
 0x419   :  { %p3709_p5 = pnand %p3707_p4, %p3704_p3 }
 0x41b   :  { %3712 = shalt.err (!%p3709_p5)
}
 0x41c   :  { %2735 = dma.vmem_to_hbm [thread:$0]  %s2733_s11, 896, %s3969_s9, [#allocation4]  }
 0x41d   :  { %3719 = dma.done.wait [#allocation4], 896  }
 0x41e   :  { %3720 = vsyncadd [#allocation4], 4294966400 }
 0x41f   :  { %2739 = vsyncpa [#allocation3], 1 }
 0x420   :  { %2740 = vsyncpa [#allocation6], 1 }
 0x421   :  { %2741 = vsyncpa [#allocation9], 1 }
 0x422   :  { %2742 = vsyncpa [#allocation4], 1 }

</bundles_post_ra>
